<compile_context>
chip_gen: v7x
topology: tpu7x:2x2x1
jax: 0.10.0
libtpu: 0.0.40
codegen_flags: <defaults>
</compile_context>

<pallas_src>
import jax
import jax.numpy as jnp
from jax.experimental import pallas as pl
from jax.experimental.pallas import tpu as pltpu

# ----------------------------- configuration --------------------------------
NUM_STAGES = 2
NUM_LAYERS = 4
NUM_F_MAPS = 8
RGB_DIM = 16
KP_DIM = 8
NUM_CLASSES = 4
FUSION_POINT = 2          # must be <= NUM_LAYERS
BATCH = 2
T = 64                    # chosen so BATCH*T is a multiple of 128 (lane-dense vregs)

TB = BATCH * T                        # fused (time, batch) lane axis (time-major, batch-minor)
PAD = 128                             # zero halo; >= BATCH*2**(NUM_LAYERS-1), 128 keeps interior lane-aligned
BUF_W = PAD + TB + PAD

assert TB % 128 == 0
assert PAD >= BATCH * (2 ** (NUM_LAYERS - 1))
assert FUSION_POINT <= NUM_LAYERS

DIM_IN = RGB_DIM + KP_DIM
L_PRE = FUSION_POINT                                              # fused (2F-channel) pre-fusion layers
L_DIL = (NUM_LAYERS - FUSION_POINT) + (NUM_STAGES - 1) * NUM_LAYERS  # F-channel dilated layers

# Column offsets inside the packed 1x1-conv slab (bias folded as the last column).
COL_IN0 = 0
COL_FUS = COL_IN0 + DIM_IN + 1
COL_OUT1 = COL_FUS + 2 * NUM_F_MAPS + 1
COL_REF = COL_OUT1 + NUM_F_MAPS + 1
REF_STRIDE = (NUM_CLASSES + 1) + (NUM_F_MAPS + 1)
P_CONV_COLS = COL_REF + (NUM_STAGES - 1) * REF_STRIDE
P_CONV_ROWS = 2 * NUM_F_MAPS


# ------------------------------- fused kernel --------------------------------
def _mstcn_fused_kernel(x0_ref, m_ref, p_pre_ref, p_dil_ref, p_conv_ref, out_ref, buf):
    F = NUM_F_MAPS
    F2 = 2 * F
    NC = NUM_CLASSES

    # Mask, pre-broadcast once (JAX does not CSE broadcast_in_dim).
    m1 = m_ref[...]                                   # (1, TB)
    m_f = jnp.broadcast_to(m1, (F, TB))
    m_2f = jnp.broadcast_to(m1, (F2, TB))
    m_c = jnp.broadcast_to(m1, (NC, TB))

    # Zero only the halo lanes (aligned, lane-dense stores, done once); the interior
    # is always overwritten before it is read.  Because lanes are time-major /
    # batch-minor, the zero halo realizes exact per-sequence Conv1d(padding=dilation).
    buf[:, 0:PAD] = jnp.zeros((F2, PAD), jnp.float32)
    buf[:, PAD + TB:BUF_W] = jnp.zeros((F2, BUF_W - PAD - TB), jnp.float32)

    def conv1x1(wb, x):
        # wb = [W | b] with the bias folded into the last column.
        return jnp.dot(wb[:, :-1], x, preferred_element_type=jnp.float32) + wb[:, -1:]

    def dilated_residual(x, w, c, dilation, m_bcast):
        # w = [Wd_prev | Wd_mid | Wd_next | Wp | bd | bp], shape (c, 4c + 2)
        s = dilation * BATCH            # time shift == lane shift (time-major packing)
        buf[0:c, PAD:PAD + TB] = x      # make x visible to the shifted halo reads
        x_prev = buf[0:c, PAD - s:PAD - s + TB]
        x_next = buf[0:c, PAD + s:PAD + s + TB]
        # Three accumulating small matmuls; the mid tap stays in registers.
        h = (jnp.dot(w[:, 0:c], x_prev, preferred_element_type=jnp.float32)
             + jnp.dot(w[:, c:2 * c], x, preferred_element_type=jnp.float32)
             + jnp.dot(w[:, 2 * c:3 * c], x_next, preferred_element_type=jnp.float32)
             + w[:, 4 * c:4 * c + 1])
        h = jnp.maximum(h, 0.0)
        h = jnp.dot(w[:, 3 * c:4 * c], h, preferred_element_type=jnp.float32) + w[:, 4 * c + 1:4 * c + 2]
        # TODO(synk): nn.Dropout is identity in eval mode; training-mode dropout not implemented.
        return (x + h) * m_bcast

    # ---------------- stage 1: two-stream segment as one block-diagonal 2F stream ----------------
    x = conv1x1(p_conv_ref[0:F2, COL_IN0:COL_FUS], x0_ref[...])     # rows 0:F = rgb_feat, F:2F = kp_feat
    for i in range(FUSION_POINT):
        x = dilated_residual(x, p_pre_ref[i], F2, 2 ** i, m_2f)

    # Fusion 1x1 conv; the channel concat is implicit (x already holds [rgb; kp]).
    x = conv1x1(p_conv_ref[0:F, COL_FUS:COL_OUT1], x)               # (F, TB)
    for j in range(NUM_LAYERS - FUSION_POINT):
        x = dilated_residual(x, p_dil_ref[j], F, 2 ** (FUSION_POINT + j), m_f)

    logits = conv1x1(p_conv_ref[0:NC, COL_OUT1:COL_REF], x) * m_c
    out_ref[0] = logits

    # ---------------- refinement stages ----------------
    base = NUM_LAYERS - FUSION_POINT
    for st in range(NUM_STAGES - 1):
        col = COL_REF + st * REF_STRIDE
        # Channel softmax (exact division for parity with F.softmax), then mask.
        p = jnp.exp(logits - jnp.max(logits, axis=0, keepdims=True))
        p = (p / jnp.sum(p, axis=0, keepdims=True)) * m_c
        x = conv1x1(p_conv_ref[0:F, col:col + NC + 1], p)
        for i in range(NUM_LAYERS):
            x = dilated_residual(x, p_dil_ref[base + st * NUM_LAYERS + i], F, 2 ** i, m_f)
        logits = conv1x1(p_conv_ref[0:NC, col + NC + 1:col + REF_STRIDE], x) * m_c
        out_ref[st + 1] = logits


# ------------------------------- wrappers ------------------------------------
def _pack_lanes(x):
    # (B, C, T) -> (C, T*B): channels on sublanes, time-major / batch-minor lanes.
    b, c, t = x.shape
    return jnp.transpose(x, (1, 2, 0)).reshape(c, t * b)


def _unpack_lanes(y, b):
    # (S, C, T*B) -> (S, B, C, T)
    s, c, tb = y.shape
    return jnp.transpose(y.reshape(s, c, tb // b, b), (0, 3, 1, 2))


def _block_diag(a, b):
    top = jnp.concatenate([a, jnp.zeros((a.shape[0], b.shape[1]), a.dtype)], axis=1)
    bot = jnp.concatenate([jnp.zeros((b.shape[0], a.shape[1]), b.dtype), b], axis=1)
    return jnp.concatenate([top, bot], axis=0)


def pack_params(p):
    """Pack the param pytree into the kernel's 3 weight slabs."""
    s1 = p["stage1"]

    # Pre-fusion rgb/kp layer pairs -> block-diagonal 2F-channel layers.
    pre = []
    for i in range(FUSION_POINT):
        lr, lk = s1["rgb_layers"][i], s1["kp_layers"][i]
        taps = [_block_diag(lr["wd"][k], lk["wd"][k]) for k in range(3)]
        wp = _block_diag(lr["wp"], lk["wp"])
        bd = jnp.concatenate([lr["bd"], lk["bd"]], axis=0)
        bp = jnp.concatenate([lr["bp"], lk["bp"]], axis=0)
        pre.append(jnp.concatenate(taps + [wp, bd, bp], axis=1))     # (2F, 8F + 2)
    p_pre = jnp.stack(pre)

    # F-channel dilated layers: stage-1 post-fusion, then refinement stages.
    def pack_layer(lp):
        return jnp.concatenate([lp["wd"][0], lp["wd"][1], lp["wd"][2],
                                lp["wp"], lp["bd"], lp["bp"]], axis=1)  # (F, 4F + 2)

    layers = list(s1["post_layers"]) + [lp for sp in p["stages"] for lp in sp["layers"]]
    assert len(layers) == L_DIL
    p_dil = jnp.stack([pack_layer(lp) for lp in layers])

    # One slab for all 1x1 convs, bias folded into the last column.
    def wb(c):
        return jnp.concatenate([c["w"], c["b"]], axis=1)

    w0 = jnp.concatenate(
        [_block_diag(s1["rgb_conv"]["w"], s1["kp_conv"]["w"]),
         jnp.concatenate([s1["rgb_conv"]["b"], s1["kp_conv"]["b"]], axis=0)], axis=1)
    blocks = [w0, wb(s1["fusion"]), wb(s1["conv_out"])]
    for sp in p["stages"]:
        blocks += [wb(sp["conv_in"]), wb(sp["conv_out"])]
    blocks = [jnp.pad(b, ((0, P_CONV_ROWS - b.shape[0]), (0, 0))) for b in blocks]
    p_conv = jnp.concatenate(blocks, axis=1)
    assert p_conv.shape == (P_CONV_ROWS, P_CONV_COLS), p_conv.shape
    return p_pre, p_dil, p_conv


def multi_stage_forward(params, rgb, kp, mask):
    p_pre, p_dil, p_conv = pack_params(params)
    x0 = _pack_lanes(jnp.concatenate([rgb, kp], axis=1))    # (DIM_IN, TB)
    m2 = _pack_lanes(mask[:, 0:1, :])                        # (1, TB)

    out = pl.pallas_call(
        _mstcn_fused_kernel,
        out_shape=jax.ShapeDtypeStruct((NUM_STAGES, NUM_CLASSES, TB), jnp.float32),
        scratch_shapes=[
            pltpu.VMEM((2 * NUM_F_MAPS, BUF_W), jnp.float32),   # shared halo'd activation buffer
        ],
    )(x0, m2, p_pre, p_dil, p_conv)

    return _unpack_lanes(out, rgb.shape[0])                  # (NUM_STAGES, B, NUM_CLASSES, T)


# ----------------------------- parameter init --------------------------------
def _init_conv1x1(key, cin, cout):
    kw, kb = jax.random.split(key)
    scale = (1.0 / cin) ** 0.5
    return {"w": scale * jax.random.normal(kw, (cout, cin), jnp.float32),
            "b": 0.1 * jax.random.normal(kb, (cout, 1), jnp.float32)}


def _init_dilated_layer(key, c):
    k1, k2, k3, k4 = jax.random.split(key, 4)
    scale_d = (1.0 / (3 * c)) ** 0.5
    scale_p = (1.0 / c) ** 0.5
    return {"wd": scale_d * jax.random.normal(k1, (3, c, c), jnp.float32),  # taps [t-d, t, t+d]
            "bd": 0.1 * jax.random.normal(k2, (c, 1), jnp.float32),
            "wp": scale_p * jax.random.normal(k3, (c, c), jnp.float32),
            "bp": 0.1 * jax.random.normal(k4, (c, 1), jnp.float32)}


def init_params(key):
    keys = jax.random.split(key, 8)
    # Stage 1 (the PyTorch module allocates NUM_LAYERS rgb/kp layers but only uses
    # the first FUSION_POINT in forward; we mirror that).
    stage1 = {
        "rgb_conv": _init_conv1x1(keys[0], RGB_DIM, NUM_F_MAPS),
        "kp_conv": _init_conv1x1(keys[1], KP_DIM, NUM_F_MAPS),
        "rgb_layers": [_init_dilated_layer(k, NUM_F_MAPS)
                       for k in jax.random.split(keys[2], NUM_LAYERS)],
        "kp_layers": [_init_dilated_layer(k, NUM_F_MAPS)
                      for k in jax.random.split(keys[3], NUM_LAYERS)],
        "fusion": _init_conv1x1(keys[4], 2 * NUM_F_MAPS, NUM_F_MAPS),
        "post_layers": [_init_dilated_layer(k, NUM_F_MAPS)
                        for k in jax.random.split(keys[5], NUM_LAYERS - FUSION_POINT)],
        "conv_out": _init_conv1x1(keys[6], NUM_F_MAPS, NUM_CLASSES),
    }
    stages = []
    for sk in jax.random.split(keys[7], NUM_STAGES - 1):
        k_in, k_layers, k_out = jax.random.split(sk, 3)
        stages.append({
            "conv_in": _init_conv1x1(k_in, NUM_CLASSES, NUM_F_MAPS),
            "layers": [_init_dilated_layer(k, NUM_F_MAPS)
                       for k in jax.random.split(k_layers, NUM_LAYERS)],
            "conv_out": _init_conv1x1(k_out, NUM_F_MAPS, NUM_CLASSES),
        })
    return {"stage1": stage1, "stages": stages}


# ---------------------------------- main --------------------------------------
if __name__ == "__main__":
    key = jax.random.PRNGKey(0)
    k_par, k_rgb, k_kp = jax.random.split(key, 3)

    params = init_params(k_par)
    rgb = jax.random.normal(k_rgb, (BATCH, RGB_DIM, T), jnp.float32)
    kp = jax.random.normal(k_kp, (BATCH, KP_DIM, T), jnp.float32)

    # MS-TCN style padding mask: sequence lengths T and 3T/4.
    lengths = jnp.array([T, (3 * T) // 4], dtype=jnp.int32)
    time_idx = jnp.arange(T, dtype=jnp.int32)
    mask = (time_idx[None, :] < lengths[:, None]).astype(jnp.float32)
    mask = jnp.broadcast_to(mask[:, None, :], (BATCH, NUM_CLASSES, T))

    fwd = jax.jit(multi_stage_forward)
    out = jax.block_until_ready(fwd(params, rgb, kp, mask))
    assert out.shape == (NUM_STAGES, BATCH, NUM_CLASSES, T), out.shape
    assert bool(jnp.all(jnp.isfinite(out)))
    print("KERNEL_OK")
</pallas_src>

<mosaic_0001>
module attributes {stable_mosaic.version = 11 : i64} {
  func.func @_mstcn_fused_kernel(%arg0: memref<24x128xf32, #tpu.memory_space<vmem>>, %arg1: memref<1x128xf32, #tpu.memory_space<vmem>>, %arg2: memref<2x16x66xf32, #tpu.memory_space<vmem>>, %arg3: memref<6x8x34xf32, #tpu.memory_space<vmem>>, %arg4: memref<16x65xf32, #tpu.memory_space<vmem>>, %arg5: memref<2x4x128xf32, #tpu.memory_space<vmem>>, %arg6: memref<16x384xf32, #tpu.memory_space<vmem>>) attributes {dimension_semantics = [], scalar_prefetch = 0 : i64, scratch_operands = 1 : i64, tpu.core_type = #tpu.core_type<tc>} {
    %c0 = arith.constant 0 : index
    %c0_0 = arith.constant 0 : index
    %0 = vector.load %arg1[%c0, %c0_0] : memref<1x128xf32, #tpu.memory_space<vmem>>, vector<1x128xf32>
    %1 = vector.shape_cast %0 : vector<1x128xf32> to vector<1x128xf32>
    %2 = vector.broadcast %1 : vector<1x128xf32> to vector<8x128xf32>
    %3 = vector.shape_cast %0 : vector<1x128xf32> to vector<1x128xf32>
    %4 = vector.broadcast %3 : vector<1x128xf32> to vector<16x128xf32>
    %5 = vector.shape_cast %0 : vector<1x128xf32> to vector<1x128xf32>
    %6 = vector.broadcast %5 : vector<1x128xf32> to vector<4x128xf32>
    %cst = arith.constant 0.000000e+00 : f32
    %7 = vector.broadcast %cst : f32 to vector<16x128xf32>
    %c0_1 = arith.constant 0 : index
    %c0_2 = arith.constant 0 : index
    %8 = vector.load %arg6[%c0_1, %c0_2] : memref<16x384xf32, #tpu.memory_space<vmem>>, vector<16x128xf32>
    tpu.vector_store %arg6[%c0_1, %c0_2], %7 {strides = array<i32>} : memref<16x384xf32, #tpu.memory_space<vmem>>, vector<16x128xf32>,
    %cst_3 = arith.constant 0.000000e+00 : f32
    %9 = vector.broadcast %cst_3 : f32 to vector<16x128xf32>
    %c0_4 = arith.constant 0 : index
    %c256 = arith.constant 256 : index
    %10 = vector.load %arg6[%c0_4, %c256] : memref<16x384xf32, #tpu.memory_space<vmem>>, vector<16x128xf32>
    tpu.vector_store %arg6[%c0_4, %c256], %9 {strides = array<i32>} : memref<16x384xf32, #tpu.memory_space<vmem>>, vector<16x128xf32>,
    %c0_5 = arith.constant 0 : index
    %c0_6 = arith.constant 0 : index
    %11 = vector.load %arg4[%c0_5, %c0_6] : memref<16x65xf32, #tpu.memory_space<vmem>>, vector<16x25xf32>
    %c0_7 = arith.constant 0 : index
    %c0_8 = arith.constant 0 : index
    %12 = vector.load %arg0[%c0_7, %c0_8] : memref<24x128xf32, #tpu.memory_space<vmem>>, vector<24x128xf32>
    %13 = vector.extract_strided_slice %11 {offsets = [0, 0], sizes = [16, 24], strides = [1, 1]} : vector<16x25xf32> to vector<16x24xf32>
    %cst_9 = arith.constant dense<0.000000e+00> : vector<16x128xf32>
    %14 = tpu.matmul %13, %12, %cst_9 {dimension_numbers = #tpu.dot_dimension_numbers<[1], [0], [0], [1], [0, 0, 1, 1], [], []>} : vector<16x24xf32>, vector<24x128xf32>, vector<16x128xf32> -> vector<16x128xf32>
    %15 = vector.extract_strided_slice %11 {offsets = [0, 24], sizes = [16, 1], strides = [1, 1]} : vector<16x25xf32> to vector<16x1xf32>
    %16 = vector.broadcast %15 : vector<16x1xf32> to vector<16x128xf32>
    %17 = arith.addf %14, %16 : vector<16x128xf32>
    %c0_10 = arith.constant 0 : index
    %c0_11 = arith.constant 0 : index
    %c0_12 = arith.constant 0 : index
    %18 = vector.load %arg2[%c0_10, %c0_11, %c0_12] : memref<2x16x66xf32, #tpu.memory_space<vmem>>, vector<1x16x66xf32>
    %19 = vector.shape_cast %18 : vector<1x16x66xf32> to vector<16x66xf32>
    %c0_13 = arith.constant 0 : index
    %c128 = arith.constant 128 : index
    %20 = vector.load %arg6[%c0_13, %c128] : memref<16x384xf32, #tpu.memory_space<vmem>>, vector<16x128xf32>
    tpu.vector_store %arg6[%c0_13, %c128], %17 {strides = array<i32>} : memref<16x384xf32, #tpu.memory_space<vmem>>, vector<16x128xf32>,
    %c0_14 = arith.constant 0 : index
    %c126 = arith.constant 126 : index
    %21 = vector.load %arg6[%c0_14, %c126] : memref<16x384xf32, #tpu.memory_space<vmem>>, vector<16x128xf32>
    %c0_15 = arith.constant 0 : index
    %c130 = arith.constant 130 : index
    %22 = vector.load %arg6[%c0_15, %c130] : memref<16x384xf32, #tpu.memory_space<vmem>>, vector<16x128xf32>
    %23 = vector.extract_strided_slice %19 {offsets = [0, 0], sizes = [16, 16], strides = [1, 1]} : vector<16x66xf32> to vector<16x16xf32>
    %cst_16 = arith.constant dense<0.000000e+00> : vector<16x128xf32>
    %24 = tpu.matmul %23, %21, %cst_16 {dimension_numbers = #tpu.dot_dimension_numbers<[1], [0], [0], [1], [0, 0, 1, 1], [], []>} : vector<16x16xf32>, vector<16x128xf32>, vector<16x128xf32> -> vector<16x128xf32>
    %25 = vector.extract_strided_slice %19 {offsets = [0, 16], sizes = [16, 16], strides = [1, 1]} : vector<16x66xf32> to vector<16x16xf32>
    %cst_17 = arith.constant dense<0.000000e+00> : vector<16x128xf32>
    %26 = tpu.matmul %25, %17, %cst_17 {dimension_numbers = #tpu.dot_dimension_numbers<[1], [0], [0], [1], [0, 0, 1, 1], [], []>} : vector<16x16xf32>, vector<16x128xf32>, vector<16x128xf32> -> vector<16x128xf32>
    %27 = arith.addf %24, %26 : vector<16x128xf32>
    %28 = vector.extract_strided_slice %19 {offsets = [0, 32], sizes = [16, 16], strides = [1, 1]} : vector<16x66xf32> to vector<16x16xf32>
    %cst_18 = arith.constant dense<0.000000e+00> : vector<16x128xf32>
    %29 = tpu.matmul %28, %22, %cst_18 {dimension_numbers = #tpu.dot_dimension_numbers<[1], [0], [0], [1], [0, 0, 1, 1], [], []>} : vector<16x16xf32>, vector<16x128xf32>, vector<16x128xf32> -> vector<16x128xf32>
    %30 = arith.addf %27, %29 : vector<16x128xf32>
    %31 = vector.extract_strided_slice %19 {offsets = [0, 64], sizes = [16, 1], strides = [1, 1]} : vector<16x66xf32> to vector<16x1xf32>
    %32 = vector.broadcast %31 : vector<16x1xf32> to vector<16x128xf32>
    %33 = arith.addf %30, %32 : vector<16x128xf32>
    %cst_19 = arith.constant 0.000000e+00 : f32
    %34 = vector.broadcast %cst_19 : f32 to vector<16x128xf32>
    %35 = arith.maximumf %33, %34 : vector<16x128xf32>
    %36 = vector.extract_strided_slice %19 {offsets = [0, 48], sizes = [16, 16], strides = [1, 1]} : vector<16x66xf32> to vector<16x16xf32>
    %cst_20 = arith.constant dense<0.000000e+00> : vector<16x128xf32>
    %37 = tpu.matmul %36, %35, %cst_20 {dimension_numbers = #tpu.dot_dimension_numbers<[1], [0], [0], [1], [0, 0, 1, 1], [], []>} : vector<16x16xf32>, vector<16x128xf32>, vector<16x128xf32> -> vector<16x128xf32>
    %38 = vector.extract_strided_slice %19 {offsets = [0, 65], sizes = [16, 1], strides = [1, 1]} : vector<16x66xf32> to vector<16x1xf32>
    %39 = vector.broadcast %38 : vector<16x1xf32> to vector<16x128xf32>
    %40 = arith.addf %37, %39 : vector<16x128xf32>
    %41 = arith.addf %17, %40 : vector<16x128xf32>
    %42 = arith.mulf %41, %4 : vector<16x128xf32>
    %c1 = arith.constant 1 : index
    %c0_21 = arith.constant 0 : index
    %c0_22 = arith.constant 0 : index
    %43 = vector.load %arg2[%c1, %c0_21, %c0_22] : memref<2x16x66xf32, #tpu.memory_space<vmem>>, vector<1x16x66xf32>
    %44 = vector.shape_cast %43 : vector<1x16x66xf32> to vector<16x66xf32>
    %c0_23 = arith.constant 0 : index
    %c128_24 = arith.constant 128 : index
    %45 = vector.load %arg6[%c0_23, %c128_24] : memref<16x384xf32, #tpu.memory_space<vmem>>, vector<16x128xf32>
    tpu.vector_store %arg6[%c0_23, %c128_24], %42 {strides = array<i32>} : memref<16x384xf32, #tpu.memory_space<vmem>>, vector<16x128xf32>,
    %c0_25 = arith.constant 0 : index
    %c124 = arith.constant 124 : index
    %46 = vector.load %arg6[%c0_25, %c124] : memref<16x384xf32, #tpu.memory_space<vmem>>, vector<16x128xf32>
    %c0_26 = arith.constant 0 : index
    %c132 = arith.constant 132 : index
    %47 = vector.load %arg6[%c0_26, %c132] : memref<16x384xf32, #tpu.memory_space<vmem>>, vector<16x128xf32>
    %48 = vector.extract_strided_slice %44 {offsets = [0, 0], sizes = [16, 16], strides = [1, 1]} : vector<16x66xf32> to vector<16x16xf32>
    %cst_27 = arith.constant dense<0.000000e+00> : vector<16x128xf32>
    %49 = tpu.matmul %48, %46, %cst_27 {dimension_numbers = #tpu.dot_dimension_numbers<[1], [0], [0], [1], [0, 0, 1, 1], [], []>} : vector<16x16xf32>, vector<16x128xf32>, vector<16x128xf32> -> vector<16x128xf32>
    %50 = vector.extract_strided_slice %44 {offsets = [0, 16], sizes = [16, 16], strides = [1, 1]} : vector<16x66xf32> to vector<16x16xf32>
    %cst_28 = arith.constant dense<0.000000e+00> : vector<16x128xf32>
    %51 = tpu.matmul %50, %42, %cst_28 {dimension_numbers = #tpu.dot_dimension_numbers<[1], [0], [0], [1], [0, 0, 1, 1], [], []>} : vector<16x16xf32>, vector<16x128xf32>, vector<16x128xf32> -> vector<16x128xf32>
    %52 = arith.addf %49, %51 : vector<16x128xf32>
    %53 = vector.extract_strided_slice %44 {offsets = [0, 32], sizes = [16, 16], strides = [1, 1]} : vector<16x66xf32> to vector<16x16xf32>
    %cst_29 = arith.constant dense<0.000000e+00> : vector<16x128xf32>
    %54 = tpu.matmul %53, %47, %cst_29 {dimension_numbers = #tpu.dot_dimension_numbers<[1], [0], [0], [1], [0, 0, 1, 1], [], []>} : vector<16x16xf32>, vector<16x128xf32>, vector<16x128xf32> -> vector<16x128xf32>
    %55 = arith.addf %52, %54 : vector<16x128xf32>
    %56 = vector.extract_strided_slice %44 {offsets = [0, 64], sizes = [16, 1], strides = [1, 1]} : vector<16x66xf32> to vector<16x1xf32>
    %57 = vector.broadcast %56 : vector<16x1xf32> to vector<16x128xf32>
    %58 = arith.addf %55, %57 : vector<16x128xf32>
    %cst_30 = arith.constant 0.000000e+00 : f32
    %59 = vector.broadcast %cst_30 : f32 to vector<16x128xf32>
    %60 = arith.maximumf %58, %59 : vector<16x128xf32>
    %61 = vector.extract_strided_slice %44 {offsets = [0, 48], sizes = [16, 16], strides = [1, 1]} : vector<16x66xf32> to vector<16x16xf32>
    %cst_31 = arith.constant dense<0.000000e+00> : vector<16x128xf32>
    %62 = tpu.matmul %61, %60, %cst_31 {dimension_numbers = #tpu.dot_dimension_numbers<[1], [0], [0], [1], [0, 0, 1, 1], [], []>} : vector<16x16xf32>, vector<16x128xf32>, vector<16x128xf32> -> vector<16x128xf32>
    %63 = vector.extract_strided_slice %44 {offsets = [0, 65], sizes = [16, 1], strides = [1, 1]} : vector<16x66xf32> to vector<16x1xf32>
    %64 = vector.broadcast %63 : vector<16x1xf32> to vector<16x128xf32>
    %65 = arith.addf %62, %64 : vector<16x128xf32>
    %66 = arith.addf %42, %65 : vector<16x128xf32>
    %67 = arith.mulf %66, %4 : vector<16x128xf32>
    %c0_32 = arith.constant 0 : index
    %c25 = arith.constant 25 : index
    %68 = vector.load %arg4[%c0_32, %c25] : memref<16x65xf32, #tpu.memory_space<vmem>>, vector<8x17xf32>
    %69 = vector.extract_strided_slice %68 {offsets = [0, 0], sizes = [8, 16], strides = [1, 1]} : vector<8x17xf32> to vector<8x16xf32>
    %cst_33 = arith.constant dense<0.000000e+00> : vector<8x128xf32>
    %70 = tpu.matmul %69, %67, %cst_33 {dimension_numbers = #tpu.dot_dimension_numbers<[1], [0], [0], [1], [0, 0, 1, 1], [], []>} : vector<8x16xf32>, vector<16x128xf32>, vector<8x128xf32> -> vector<8x128xf32>
    %71 = vector.extract_strided_slice %68 {offsets = [0, 16], sizes = [8, 1], strides = [1, 1]} : vector<8x17xf32> to vector<8x1xf32>
    %72 = vector.broadcast %71 : vector<8x1xf32> to vector<8x128xf32>
    %73 = arith.addf %70, %72 : vector<8x128xf32>
    %c0_34 = arith.constant 0 : index
    %c0_35 = arith.constant 0 : index
    %c0_36 = arith.constant 0 : index
    %74 = vector.load %arg3[%c0_34, %c0_35, %c0_36] : memref<6x8x34xf32, #tpu.memory_space<vmem>>, vector<1x8x34xf32>
    %75 = vector.shape_cast %74 : vector<1x8x34xf32> to vector<8x34xf32>
    %c0_37 = arith.constant 0 : index
    %c128_38 = arith.constant 128 : index
    %76 = vector.load %arg6[%c0_37, %c128_38] : memref<16x384xf32, #tpu.memory_space<vmem>>, vector<8x128xf32>
    tpu.vector_store %arg6[%c0_37, %c128_38], %73 {strides = array<i32>} : memref<16x384xf32, #tpu.memory_space<vmem>>, vector<8x128xf32>,
    %c0_39 = arith.constant 0 : index
    %c120 = arith.constant 120 : index
    %77 = vector.load %arg6[%c0_39, %c120] : memref<16x384xf32, #tpu.memory_space<vmem>>, vector<8x128xf32>
    %c0_40 = arith.constant 0 : index
    %c136 = arith.constant 136 : index
    %78 = vector.load %arg6[%c0_40, %c136] : memref<16x384xf32, #tpu.memory_space<vmem>>, vector<8x128xf32>
    %79 = vector.extract_strided_slice %75 {offsets = [0, 0], sizes = [8, 8], strides = [1, 1]} : vector<8x34xf32> to vector<8x8xf32>
    %cst_41 = arith.constant dense<0.000000e+00> : vector<8x128xf32>
    %80 = tpu.matmul %79, %77, %cst_41 {dimension_numbers = #tpu.dot_dimension_numbers<[1], [0], [0], [1], [0, 0, 1, 1], [], []>} : vector<8x8xf32>, vector<8x128xf32>, vector<8x128xf32> -> vector<8x128xf32>
    %81 = vector.extract_strided_slice %75 {offsets = [0, 8], sizes = [8, 8], strides = [1, 1]} : vector<8x34xf32> to vector<8x8xf32>
    %cst_42 = arith.constant dense<0.000000e+00> : vector<8x128xf32>
    %82 = tpu.matmul %81, %73, %cst_42 {dimension_numbers = #tpu.dot_dimension_numbers<[1], [0], [0], [1], [0, 0, 1, 1], [], []>} : vector<8x8xf32>, vector<8x128xf32>, vector<8x128xf32> -> vector<8x128xf32>
    %83 = arith.addf %80, %82 : vector<8x128xf32>
    %84 = vector.extract_strided_slice %75 {offsets = [0, 16], sizes = [8, 8], strides = [1, 1]} : vector<8x34xf32> to vector<8x8xf32>
    %cst_43 = arith.constant dense<0.000000e+00> : vector<8x128xf32>
    %85 = tpu.matmul %84, %78, %cst_43 {dimension_numbers = #tpu.dot_dimension_numbers<[1], [0], [0], [1], [0, 0, 1, 1], [], []>} : vector<8x8xf32>, vector<8x128xf32>, vector<8x128xf32> -> vector<8x128xf32>
    %86 = arith.addf %83, %85 : vector<8x128xf32>
    %87 = vector.extract_strided_slice %75 {offsets = [0, 32], sizes = [8, 1], strides = [1, 1]} : vector<8x34xf32> to vector<8x1xf32>
    %88 = vector.broadcast %87 : vector<8x1xf32> to vector<8x128xf32>
    %89 = arith.addf %86, %88 : vector<8x128xf32>
    %cst_44 = arith.constant 0.000000e+00 : f32
    %90 = vector.broadcast %cst_44 : f32 to vector<8x128xf32>
    %91 = arith.maximumf %89, %90 : vector<8x128xf32>
    %92 = vector.extract_strided_slice %75 {offsets = [0, 24], sizes = [8, 8], strides = [1, 1]} : vector<8x34xf32> to vector<8x8xf32>
    %cst_45 = arith.constant dense<0.000000e+00> : vector<8x128xf32>
    %93 = tpu.matmul %92, %91, %cst_45 {dimension_numbers = #tpu.dot_dimension_numbers<[1], [0], [0], [1], [0, 0, 1, 1], [], []>} : vector<8x8xf32>, vector<8x128xf32>, vector<8x128xf32> -> vector<8x128xf32>
    %94 = vector.extract_strided_slice %75 {offsets = [0, 33], sizes = [8, 1], strides = [1, 1]} : vector<8x34xf32> to vector<8x1xf32>
    %95 = vector.broadcast %94 : vector<8x1xf32> to vector<8x128xf32>
    %96 = arith.addf %93, %95 : vector<8x128xf32>
    %97 = arith.addf %73, %96 : vector<8x128xf32>
    %98 = arith.mulf %97, %2 : vector<8x128xf32>
    %c1_46 = arith.constant 1 : index
    %c0_47 = arith.constant 0 : index
    %c0_48 = arith.constant 0 : index
    %99 = vector.load %arg3[%c1_46, %c0_47, %c0_48] : memref<6x8x34xf32, #tpu.memory_space<vmem>>, vector<1x8x34xf32>
    %100 = vector.shape_cast %99 : vector<1x8x34xf32> to vector<8x34xf32>
    %c0_49 = arith.constant 0 : index
    %c128_50 = arith.constant 128 : index
    %101 = vector.load %arg6[%c0_49, %c128_50] : memref<16x384xf32, #tpu.memory_space<vmem>>, vector<8x128xf32>
    tpu.vector_store %arg6[%c0_49, %c128_50], %98 {strides = array<i32>} : memref<16x384xf32, #tpu.memory_space<vmem>>, vector<8x128xf32>,
    %c0_51 = arith.constant 0 : index
    %c112 = arith.constant 112 : index
    %102 = vector.load %arg6[%c0_51, %c112] : memref<16x384xf32, #tpu.memory_space<vmem>>, vector<8x128xf32>
    %c0_52 = arith.constant 0 : index
    %c144 = arith.constant 144 : index
    %103 = vector.load %arg6[%c0_52, %c144] : memref<16x384xf32, #tpu.memory_space<vmem>>, vector<8x128xf32>
    %104 = vector.extract_strided_slice %100 {offsets = [0, 0], sizes = [8, 8], strides = [1, 1]} : vector<8x34xf32> to vector<8x8xf32>
    %cst_53 = arith.constant dense<0.000000e+00> : vector<8x128xf32>
    %105 = tpu.matmul %104, %102, %cst_53 {dimension_numbers = #tpu.dot_dimension_numbers<[1], [0], [0], [1], [0, 0, 1, 1], [], []>} : vector<8x8xf32>, vector<8x128xf32>, vector<8x128xf32> -> vector<8x128xf32>
    %106 = vector.extract_strided_slice %100 {offsets = [0, 8], sizes = [8, 8], strides = [1, 1]} : vector<8x34xf32> to vector<8x8xf32>
    %cst_54 = arith.constant dense<0.000000e+00> : vector<8x128xf32>
    %107 = tpu.matmul %106, %98, %cst_54 {dimension_numbers = #tpu.dot_dimension_numbers<[1], [0], [0], [1], [0, 0, 1, 1], [], []>} : vector<8x8xf32>, vector<8x128xf32>, vector<8x128xf32> -> vector<8x128xf32>
    %108 = arith.addf %105, %107 : vector<8x128xf32>
    %109 = vector.extract_strided_slice %100 {offsets = [0, 16], sizes = [8, 8], strides = [1, 1]} : vector<8x34xf32> to vector<8x8xf32>
    %cst_55 = arith.constant dense<0.000000e+00> : vector<8x128xf32>
    %110 = tpu.matmul %109, %103, %cst_55 {dimension_numbers = #tpu.dot_dimension_numbers<[1], [0], [0], [1], [0, 0, 1, 1], [], []>} : vector<8x8xf32>, vector<8x128xf32>, vector<8x128xf32> -> vector<8x128xf32>
    %111 = arith.addf %108, %110 : vector<8x128xf32>
    %112 = vector.extract_strided_slice %100 {offsets = [0, 32], sizes = [8, 1], strides = [1, 1]} : vector<8x34xf32> to vector<8x1xf32>
    %113 = vector.broadcast %112 : vector<8x1xf32> to vector<8x128xf32>
    %114 = arith.addf %111, %113 : vector<8x128xf32>
    %cst_56 = arith.constant 0.000000e+00 : f32
    %115 = vector.broadcast %cst_56 : f32 to vector<8x128xf32>
    %116 = arith.maximumf %114, %115 : vector<8x128xf32>
    %117 = vector.extract_strided_slice %100 {offsets = [0, 24], sizes = [8, 8], strides = [1, 1]} : vector<8x34xf32> to vector<8x8xf32>
    %cst_57 = arith.constant dense<0.000000e+00> : vector<8x128xf32>
    %118 = tpu.matmul %117, %116, %cst_57 {dimension_numbers = #tpu.dot_dimension_numbers<[1], [0], [0], [1], [0, 0, 1, 1], [], []>} : vector<8x8xf32>, vector<8x128xf32>, vector<8x128xf32> -> vector<8x128xf32>
    %119 = vector.extract_strided_slice %100 {offsets = [0, 33], sizes = [8, 1], strides = [1, 1]} : vector<8x34xf32> to vector<8x1xf32>
    %120 = vector.broadcast %119 : vector<8x1xf32> to vector<8x128xf32>
    %121 = arith.addf %118, %120 : vector<8x128xf32>
    %122 = arith.addf %98, %121 : vector<8x128xf32>
    %123 = arith.mulf %122, %2 : vector<8x128xf32>
    %c0_58 = arith.constant 0 : index
    %c42 = arith.constant 42 : index
    %124 = vector.load %arg4[%c0_58, %c42] : memref<16x65xf32, #tpu.memory_space<vmem>>, vector<4x9xf32>
    %125 = vector.extract_strided_slice %124 {offsets = [0, 0], sizes = [4, 8], strides = [1, 1]} : vector<4x9xf32> to vector<4x8xf32>
    %cst_59 = arith.constant dense<0.000000e+00> : vector<4x128xf32>
    %126 = tpu.matmul %125, %123, %cst_59 {dimension_numbers = #tpu.dot_dimension_numbers<[1], [0], [0], [1], [0, 0, 1, 1], [], []>} : vector<4x8xf32>, vector<8x128xf32>, vector<4x128xf32> -> vector<4x128xf32>
    %127 = vector.extract_strided_slice %124 {offsets = [0, 8], sizes = [4, 1], strides = [1, 1]} : vector<4x9xf32> to vector<4x1xf32>
    %128 = vector.broadcast %127 : vector<4x1xf32> to vector<4x128xf32>
    %129 = arith.addf %126, %128 : vector<4x128xf32>
    %130 = arith.mulf %129, %6 : vector<4x128xf32>
    %c0_60 = arith.constant 0 : index
    %c0_61 = arith.constant 0 : index
    %c0_62 = arith.constant 0 : index
    %131 = vector.load %arg5[%c0_60, %c0_61, %c0_62] : memref<2x4x128xf32, #tpu.memory_space<vmem>>, vector<1x4x128xf32>
    %132 = vector.shape_cast %131 : vector<1x4x128xf32> to vector<4x128xf32>
    %133 = vector.shape_cast %130 : vector<4x128xf32> to vector<1x4x128xf32>
    tpu.vector_store %arg5[%c0_60, %c0_61, %c0_62], %133 {strides = array<i32>} : memref<2x4x128xf32, #tpu.memory_space<vmem>>, vector<1x4x128xf32>,
    %cst_63 = arith.constant dense<0xFF800000> : vector<128xf32>
    %134 = vector.multi_reduction <maximumf>, %130, %cst_63 [0] : vector<4x128xf32> to vector<128xf32>
    %135 = vector.shape_cast %134 : vector<128xf32> to vector<1x128xf32>
    %136 = vector.broadcast %135 : vector<1x128xf32> to vector<4x128xf32>
    %137 = arith.subf %130, %136 : vector<4x128xf32>
    %138 = math.exp %137 : vector<4x128xf32>
    %cst_64 = arith.constant dense<0.000000e+00> : vector<128xf32>
    %139 = vector.multi_reduction <add>, %138, %cst_64 [0] : vector<4x128xf32> to vector<128xf32>
    %140 = vector.shape_cast %139 : vector<128xf32> to vector<1x128xf32>
    %141 = vector.broadcast %140 : vector<1x128xf32> to vector<4x128xf32>
    %142 = arith.divf %138, %141 : vector<4x128xf32>
    %143 = arith.mulf %142, %6 : vector<4x128xf32>
    %c0_65 = arith.constant 0 : index
    %c51 = arith.constant 51 : index
    %144 = vector.load %arg4[%c0_65, %c51] : memref<16x65xf32, #tpu.memory_space<vmem>>, vector<8x5xf32>
    %145 = vector.extract_strided_slice %144 {offsets = [0, 0], sizes = [8, 4], strides = [1, 1]} : vector<8x5xf32> to vector<8x4xf32>
    %cst_66 = arith.constant dense<0.000000e+00> : vector<8x128xf32>
    %146 = tpu.matmul %145, %143, %cst_66 {dimension_numbers = #tpu.dot_dimension_numbers<[1], [0], [0], [1], [0, 0, 1, 1], [], []>} : vector<8x4xf32>, vector<4x128xf32>, vector<8x128xf32> -> vector<8x128xf32>
    %147 = vector.extract_strided_slice %144 {offsets = [0, 4], sizes = [8, 1], strides = [1, 1]} : vector<8x5xf32> to vector<8x1xf32>
    %148 = vector.broadcast %147 : vector<8x1xf32> to vector<8x128xf32>
    %149 = arith.addf %146, %148 : vector<8x128xf32>
    %c2 = arith.constant 2 : index
    %c0_67 = arith.constant 0 : index
    %c0_68 = arith.constant 0 : index
    %150 = vector.load %arg3[%c2, %c0_67, %c0_68] : memref<6x8x34xf32, #tpu.memory_space<vmem>>, vector<1x8x34xf32>
    %151 = vector.shape_cast %150 : vector<1x8x34xf32> to vector<8x34xf32>
    %c0_69 = arith.constant 0 : index
    %c128_70 = arith.constant 128 : index
    %152 = vector.load %arg6[%c0_69, %c128_70] : memref<16x384xf32, #tpu.memory_space<vmem>>, vector<8x128xf32>
    tpu.vector_store %arg6[%c0_69, %c128_70], %149 {strides = array<i32>} : memref<16x384xf32, #tpu.memory_space<vmem>>, vector<8x128xf32>,
    %c0_71 = arith.constant 0 : index
    %c126_72 = arith.constant 126 : index
    %153 = vector.load %arg6[%c0_71, %c126_72] : memref<16x384xf32, #tpu.memory_space<vmem>>, vector<8x128xf32>
    %c0_73 = arith.constant 0 : index
    %c130_74 = arith.constant 130 : index
    %154 = vector.load %arg6[%c0_73, %c130_74] : memref<16x384xf32, #tpu.memory_space<vmem>>, vector<8x128xf32>
    %155 = vector.extract_strided_slice %151 {offsets = [0, 0], sizes = [8, 8], strides = [1, 1]} : vector<8x34xf32> to vector<8x8xf32>
    %cst_75 = arith.constant dense<0.000000e+00> : vector<8x128xf32>
    %156 = tpu.matmul %155, %153, %cst_75 {dimension_numbers = #tpu.dot_dimension_numbers<[1], [0], [0], [1], [0, 0, 1, 1], [], []>} : vector<8x8xf32>, vector<8x128xf32>, vector<8x128xf32> -> vector<8x128xf32>
    %157 = vector.extract_strided_slice %151 {offsets = [0, 8], sizes = [8, 8], strides = [1, 1]} : vector<8x34xf32> to vector<8x8xf32>
    %cst_76 = arith.constant dense<0.000000e+00> : vector<8x128xf32>
    %158 = tpu.matmul %157, %149, %cst_76 {dimension_numbers = #tpu.dot_dimension_numbers<[1], [0], [0], [1], [0, 0, 1, 1], [], []>} : vector<8x8xf32>, vector<8x128xf32>, vector<8x128xf32> -> vector<8x128xf32>
    %159 = arith.addf %156, %158 : vector<8x128xf32>
    %160 = vector.extract_strided_slice %151 {offsets = [0, 16], sizes = [8, 8], strides = [1, 1]} : vector<8x34xf32> to vector<8x8xf32>
    %cst_77 = arith.constant dense<0.000000e+00> : vector<8x128xf32>
    %161 = tpu.matmul %160, %154, %cst_77 {dimension_numbers = #tpu.dot_dimension_numbers<[1], [0], [0], [1], [0, 0, 1, 1], [], []>} : vector<8x8xf32>, vector<8x128xf32>, vector<8x128xf32> -> vector<8x128xf32>
    %162 = arith.addf %159, %161 : vector<8x128xf32>
    %163 = vector.extract_strided_slice %151 {offsets = [0, 32], sizes = [8, 1], strides = [1, 1]} : vector<8x34xf32> to vector<8x1xf32>
    %164 = vector.broadcast %163 : vector<8x1xf32> to vector<8x128xf32>
    %165 = arith.addf %162, %164 : vector<8x128xf32>
    %cst_78 = arith.constant 0.000000e+00 : f32
    %166 = vector.broadcast %cst_78 : f32 to vector<8x128xf32>
    %167 = arith.maximumf %165, %166 : vector<8x128xf32>
    %168 = vector.extract_strided_slice %151 {offsets = [0, 24], sizes = [8, 8], strides = [1, 1]} : vector<8x34xf32> to vector<8x8xf32>
    %cst_79 = arith.constant dense<0.000000e+00> : vector<8x128xf32>
    %169 = tpu.matmul %168, %167, %cst_79 {dimension_numbers = #tpu.dot_dimension_numbers<[1], [0], [0], [1], [0, 0, 1, 1], [], []>} : vector<8x8xf32>, vector<8x128xf32>, vector<8x128xf32> -> vector<8x128xf32>
    %170 = vector.extract_strided_slice %151 {offsets = [0, 33], sizes = [8, 1], strides = [1, 1]} : vector<8x34xf32> to vector<8x1xf32>
    %171 = vector.broadcast %170 : vector<8x1xf32> to vector<8x128xf32>
    %172 = arith.addf %169, %171 : vector<8x128xf32>
    %173 = arith.addf %149, %172 : vector<8x128xf32>
    %174 = arith.mulf %173, %2 : vector<8x128xf32>
    %c3 = arith.constant 3 : index
    %c0_80 = arith.constant 0 : index
    %c0_81 = arith.constant 0 : index
    %175 = vector.load %arg3[%c3, %c0_80, %c0_81] : memref<6x8x34xf32, #tpu.memory_space<vmem>>, vector<1x8x34xf32>
    %176 = vector.shape_cast %175 : vector<1x8x34xf32> to vector<8x34xf32>
    %c0_82 = arith.constant 0 : index
    %c128_83 = arith.constant 128 : index
    %177 = vector.load %arg6[%c0_82, %c128_83] : memref<16x384xf32, #tpu.memory_space<vmem>>, vector<8x128xf32>
    tpu.vector_store %arg6[%c0_82, %c128_83], %174 {strides = array<i32>} : memref<16x384xf32, #tpu.memory_space<vmem>>, vector<8x128xf32>,
    %c0_84 = arith.constant 0 : index
    %c124_85 = arith.constant 124 : index
    %178 = vector.load %arg6[%c0_84, %c124_85] : memref<16x384xf32, #tpu.memory_space<vmem>>, vector<8x128xf32>
    %c0_86 = arith.constant 0 : index
    %c132_87 = arith.constant 132 : index
    %179 = vector.load %arg6[%c0_86, %c132_87] : memref<16x384xf32, #tpu.memory_space<vmem>>, vector<8x128xf32>
    %180 = vector.extract_strided_slice %176 {offsets = [0, 0], sizes = [8, 8], strides = [1, 1]} : vector<8x34xf32> to vector<8x8xf32>
    %cst_88 = arith.constant dense<0.000000e+00> : vector<8x128xf32>
    %181 = tpu.matmul %180, %178, %cst_88 {dimension_numbers = #tpu.dot_dimension_numbers<[1], [0], [0], [1], [0, 0, 1, 1], [], []>} : vector<8x8xf32>, vector<8x128xf32>, vector<8x128xf32> -> vector<8x128xf32>
    %182 = vector.extract_strided_slice %176 {offsets = [0, 8], sizes = [8, 8], strides = [1, 1]} : vector<8x34xf32> to vector<8x8xf32>
    %cst_89 = arith.constant dense<0.000000e+00> : vector<8x128xf32>
    %183 = tpu.matmul %182, %174, %cst_89 {dimension_numbers = #tpu.dot_dimension_numbers<[1], [0], [0], [1], [0, 0, 1, 1], [], []>} : vector<8x8xf32>, vector<8x128xf32>, vector<8x128xf32> -> vector<8x128xf32>
    %184 = arith.addf %181, %183 : vector<8x128xf32>
    %185 = vector.extract_strided_slice %176 {offsets = [0, 16], sizes = [8, 8], strides = [1, 1]} : vector<8x34xf32> to vector<8x8xf32>
    %cst_90 = arith.constant dense<0.000000e+00> : vector<8x128xf32>
    %186 = tpu.matmul %185, %179, %cst_90 {dimension_numbers = #tpu.dot_dimension_numbers<[1], [0], [0], [1], [0, 0, 1, 1], [], []>} : vector<8x8xf32>, vector<8x128xf32>, vector<8x128xf32> -> vector<8x128xf32>
    %187 = arith.addf %184, %186 : vector<8x128xf32>
    %188 = vector.extract_strided_slice %176 {offsets = [0, 32], sizes = [8, 1], strides = [1, 1]} : vector<8x34xf32> to vector<8x1xf32>
    %189 = vector.broadcast %188 : vector<8x1xf32> to vector<8x128xf32>
    %190 = arith.addf %187, %189 : vector<8x128xf32>
    %cst_91 = arith.constant 0.000000e+00 : f32
    %191 = vector.broadcast %cst_91 : f32 to vector<8x128xf32>
    %192 = arith.maximumf %190, %191 : vector<8x128xf32>
    %193 = vector.extract_strided_slice %176 {offsets = [0, 24], sizes = [8, 8], strides = [1, 1]} : vector<8x34xf32> to vector<8x8xf32>
    %cst_92 = arith.constant dense<0.000000e+00> : vector<8x128xf32>
    %194 = tpu.matmul %193, %192, %cst_92 {dimension_numbers = #tpu.dot_dimension_numbers<[1], [0], [0], [1], [0, 0, 1, 1], [], []>} : vector<8x8xf32>, vector<8x128xf32>, vector<8x128xf32> -> vector<8x128xf32>
    %195 = vector.extract_strided_slice %176 {offsets = [0, 33], sizes = [8, 1], strides = [1, 1]} : vector<8x34xf32> to vector<8x1xf32>
    %196 = vector.broadcast %195 : vector<8x1xf32> to vector<8x128xf32>
    %197 = arith.addf %194, %196 : vector<8x128xf32>
    %198 = arith.addf %174, %197 : vector<8x128xf32>
    %199 = arith.mulf %198, %2 : vector<8x128xf32>
    %c4 = arith.constant 4 : index
    %c0_93 = arith.constant 0 : index
    %c0_94 = arith.constant 0 : index
    %200 = vector.load %arg3[%c4, %c0_93, %c0_94] : memref<6x8x34xf32, #tpu.memory_space<vmem>>, vector<1x8x34xf32>
    %201 = vector.shape_cast %200 : vector<1x8x34xf32> to vector<8x34xf32>
    %c0_95 = arith.constant 0 : index
    %c128_96 = arith.constant 128 : index
    %202 = vector.load %arg6[%c0_95, %c128_96] : memref<16x384xf32, #tpu.memory_space<vmem>>, vector<8x128xf32>
    tpu.vector_store %arg6[%c0_95, %c128_96], %199 {strides = array<i32>} : memref<16x384xf32, #tpu.memory_space<vmem>>, vector<8x128xf32>,
    %c0_97 = arith.constant 0 : index
    %c120_98 = arith.constant 120 : index
    %203 = vector.load %arg6[%c0_97, %c120_98] : memref<16x384xf32, #tpu.memory_space<vmem>>, vector<8x128xf32>
    %c0_99 = arith.constant 0 : index
    %c136_100 = arith.constant 136 : index
    %204 = vector.load %arg6[%c0_99, %c136_100] : memref<16x384xf32, #tpu.memory_space<vmem>>, vector<8x128xf32>
    %205 = vector.extract_strided_slice %201 {offsets = [0, 0], sizes = [8, 8], strides = [1, 1]} : vector<8x34xf32> to vector<8x8xf32>
    %cst_101 = arith.constant dense<0.000000e+00> : vector<8x128xf32>
    %206 = tpu.matmul %205, %203, %cst_101 {dimension_numbers = #tpu.dot_dimension_numbers<[1], [0], [0], [1], [0, 0, 1, 1], [], []>} : vector<8x8xf32>, vector<8x128xf32>, vector<8x128xf32> -> vector<8x128xf32>
    %207 = vector.extract_strided_slice %201 {offsets = [0, 8], sizes = [8, 8], strides = [1, 1]} : vector<8x34xf32> to vector<8x8xf32>
    %cst_102 = arith.constant dense<0.000000e+00> : vector<8x128xf32>
    %208 = tpu.matmul %207, %199, %cst_102 {dimension_numbers = #tpu.dot_dimension_numbers<[1], [0], [0], [1], [0, 0, 1, 1], [], []>} : vector<8x8xf32>, vector<8x128xf32>, vector<8x128xf32> -> vector<8x128xf32>
    %209 = arith.addf %206, %208 : vector<8x128xf32>
    %210 = vector.extract_strided_slice %201 {offsets = [0, 16], sizes = [8, 8], strides = [1, 1]} : vector<8x34xf32> to vector<8x8xf32>
    %cst_103 = arith.constant dense<0.000000e+00> : vector<8x128xf32>
    %211 = tpu.matmul %210, %204, %cst_103 {dimension_numbers = #tpu.dot_dimension_numbers<[1], [0], [0], [1], [0, 0, 1, 1], [], []>} : vector<8x8xf32>, vector<8x128xf32>, vector<8x128xf32> -> vector<8x128xf32>
    %212 = arith.addf %209, %211 : vector<8x128xf32>
    %213 = vector.extract_strided_slice %201 {offsets = [0, 32], sizes = [8, 1], strides = [1, 1]} : vector<8x34xf32> to vector<8x1xf32>
    %214 = vector.broadcast %213 : vector<8x1xf32> to vector<8x128xf32>
    %215 = arith.addf %212, %214 : vector<8x128xf32>
    %cst_104 = arith.constant 0.000000e+00 : f32
    %216 = vector.broadcast %cst_104 : f32 to vector<8x128xf32>
    %217 = arith.maximumf %215, %216 : vector<8x128xf32>
    %218 = vector.extract_strided_slice %201 {offsets = [0, 24], sizes = [8, 8], strides = [1, 1]} : vector<8x34xf32> to vector<8x8xf32>
    %cst_105 = arith.constant dense<0.000000e+00> : vector<8x128xf32>
    %219 = tpu.matmul %218, %217, %cst_105 {dimension_numbers = #tpu.dot_dimension_numbers<[1], [0], [0], [1], [0, 0, 1, 1], [], []>} : vector<8x8xf32>, vector<8x128xf32>, vector<8x128xf32> -> vector<8x128xf32>
    %220 = vector.extract_strided_slice %201 {offsets = [0, 33], sizes = [8, 1], strides = [1, 1]} : vector<8x34xf32> to vector<8x1xf32>
    %221 = vector.broadcast %220 : vector<8x1xf32> to vector<8x128xf32>
    %222 = arith.addf %219, %221 : vector<8x128xf32>
    %223 = arith.addf %199, %222 : vector<8x128xf32>
    %224 = arith.mulf %223, %2 : vector<8x128xf32>
    %c5 = arith.constant 5 : index
    %c0_106 = arith.constant 0 : index
    %c0_107 = arith.constant 0 : index
    %225 = vector.load %arg3[%c5, %c0_106, %c0_107] : memref<6x8x34xf32, #tpu.memory_space<vmem>>, vector<1x8x34xf32>
    %226 = vector.shape_cast %225 : vector<1x8x34xf32> to vector<8x34xf32>
    %c0_108 = arith.constant 0 : index
    %c128_109 = arith.constant 128 : index
    %227 = vector.load %arg6[%c0_108, %c128_109] : memref<16x384xf32, #tpu.memory_space<vmem>>, vector<8x128xf32>
    tpu.vector_store %arg6[%c0_108, %c128_109], %224 {strides = array<i32>} : memref<16x384xf32, #tpu.memory_space<vmem>>, vector<8x128xf32>,
    %c0_110 = arith.constant 0 : index
    %c112_111 = arith.constant 112 : index
    %228 = vector.load %arg6[%c0_110, %c112_111] : memref<16x384xf32, #tpu.memory_space<vmem>>, vector<8x128xf32>
    %c0_112 = arith.constant 0 : index
    %c144_113 = arith.constant 144 : index
    %229 = vector.load %arg6[%c0_112, %c144_113] : memref<16x384xf32, #tpu.memory_space<vmem>>, vector<8x128xf32>
    %230 = vector.extract_strided_slice %226 {offsets = [0, 0], sizes = [8, 8], strides = [1, 1]} : vector<8x34xf32> to vector<8x8xf32>
    %cst_114 = arith.constant dense<0.000000e+00> : vector<8x128xf32>
    %231 = tpu.matmul %230, %228, %cst_114 {dimension_numbers = #tpu.dot_dimension_numbers<[1], [0], [0], [1], [0, 0, 1, 1], [], []>} : vector<8x8xf32>, vector<8x128xf32>, vector<8x128xf32> -> vector<8x128xf32>
    %232 = vector.extract_strided_slice %226 {offsets = [0, 8], sizes = [8, 8], strides = [1, 1]} : vector<8x34xf32> to vector<8x8xf32>
    %cst_115 = arith.constant dense<0.000000e+00> : vector<8x128xf32>
    %233 = tpu.matmul %232, %224, %cst_115 {dimension_numbers = #tpu.dot_dimension_numbers<[1], [0], [0], [1], [0, 0, 1, 1], [], []>} : vector<8x8xf32>, vector<8x128xf32>, vector<8x128xf32> -> vector<8x128xf32>
    %234 = arith.addf %231, %233 : vector<8x128xf32>
    %235 = vector.extract_strided_slice %226 {offsets = [0, 16], sizes = [8, 8], strides = [1, 1]} : vector<8x34xf32> to vector<8x8xf32>
    %cst_116 = arith.constant dense<0.000000e+00> : vector<8x128xf32>
    %236 = tpu.matmul %235, %229, %cst_116 {dimension_numbers = #tpu.dot_dimension_numbers<[1], [0], [0], [1], [0, 0, 1, 1], [], []>} : vector<8x8xf32>, vector<8x128xf32>, vector<8x128xf32> -> vector<8x128xf32>
    %237 = arith.addf %234, %236 : vector<8x128xf32>
    %238 = vector.extract_strided_slice %226 {offsets = [0, 32], sizes = [8, 1], strides = [1, 1]} : vector<8x34xf32> to vector<8x1xf32>
    %239 = vector.broadcast %238 : vector<8x1xf32> to vector<8x128xf32>
    %240 = arith.addf %237, %239 : vector<8x128xf32>
    %cst_117 = arith.constant 0.000000e+00 : f32
    %241 = vector.broadcast %cst_117 : f32 to vector<8x128xf32>
    %242 = arith.maximumf %240, %241 : vector<8x128xf32>
    %243 = vector.extract_strided_slice %226 {offsets = [0, 24], sizes = [8, 8], strides = [1, 1]} : vector<8x34xf32> to vector<8x8xf32>
    %cst_118 = arith.constant dense<0.000000e+00> : vector<8x128xf32>
    %244 = tpu.matmul %243, %242, %cst_118 {dimension_numbers = #tpu.dot_dimension_numbers<[1], [0], [0], [1], [0, 0, 1, 1], [], []>} : vector<8x8xf32>, vector<8x128xf32>, vector<8x128xf32> -> vector<8x128xf32>
    %245 = vector.extract_strided_slice %226 {offsets = [0, 33], sizes = [8, 1], strides = [1, 1]} : vector<8x34xf32> to vector<8x1xf32>
    %246 = vector.broadcast %245 : vector<8x1xf32> to vector<8x128xf32>
    %247 = arith.addf %244, %246 : vector<8x128xf32>
    %248 = arith.addf %224, %247 : vector<8x128xf32>
    %249 = arith.mulf %248, %2 : vector<8x128xf32>
    %c0_119 = arith.constant 0 : index
    %c56 = arith.constant 56 : index
    %250 = vector.load %arg4[%c0_119, %c56] : memref<16x65xf32, #tpu.memory_space<vmem>>, vector<4x9xf32>
    %251 = vector.extract_strided_slice %250 {offsets = [0, 0], sizes = [4, 8], strides = [1, 1]} : vector<4x9xf32> to vector<4x8xf32>
    %cst_120 = arith.constant dense<0.000000e+00> : vector<4x128xf32>
    %252 = tpu.matmul %251, %249, %cst_120 {dimension_numbers = #tpu.dot_dimension_numbers<[1], [0], [0], [1], [0, 0, 1, 1], [], []>} : vector<4x8xf32>, vector<8x128xf32>, vector<4x128xf32> -> vector<4x128xf32>
    %253 = vector.extract_strided_slice %250 {offsets = [0, 8], sizes = [4, 1], strides = [1, 1]} : vector<4x9xf32> to vector<4x1xf32>
    %254 = vector.broadcast %253 : vector<4x1xf32> to vector<4x128xf32>
    %255 = arith.addf %252, %254 : vector<4x128xf32>
    %256 = arith.mulf %255, %6 : vector<4x128xf32>
    %c1_121 = arith.constant 1 : index
    %c0_122 = arith.constant 0 : index
    %c0_123 = arith.constant 0 : index
    %257 = vector.load %arg5[%c1_121, %c0_122, %c0_123] : memref<2x4x128xf32, #tpu.memory_space<vmem>>, vector<1x4x128xf32>
    %258 = vector.shape_cast %257 : vector<1x4x128xf32> to vector<4x128xf32>
    %259 = vector.shape_cast %256 : vector<4x128xf32> to vector<1x4x128xf32>
    tpu.vector_store %arg5[%c1_121, %c0_122, %c0_123], %259 {strides = array<i32>} : memref<2x4x128xf32, #tpu.memory_space<vmem>>, vector<1x4x128xf32>,
    return
  }
}

</mosaic_0001>

<bundles_post_ra>
// kernel: multi_stage_forward.1
= control target key start
LH: loop header
LB: loop body
LE: loop exit
PB: predicated region body
PF: predicated region fallthrough
CT: control target
= control target key end

     0   :  { %vm46_vm0 = vcmask 195584   ;;  %v3757_v2 = vmov 24   ;;  %s3758_s30 = smov 112   ;;  %vm144_vm1 = vcmask 130048   ;;  %v3759_v16 = vmov 0.0   ;;  %s3760_s7 = smov 2   ;;  %s4200_s0 = inlined_call_operand.vmem [shape: f32[24,128], index: 0, kind: input, shape index: {}]   ;;  %s4201_s4 = inlined_call_operand.vmem [shape: f32[16,65], index: 4, kind: input, shape index: {}]   ;;  %s4202_s2 = inlined_call_operand.vmem [shape: f32[2,16,66], index: 2, kind: input, shape index: {}]   ;;  %s4203_s1 = inlined_call_operand.vmem [shape: f32[1,128], index: 1, kind: input, shape index: {}]   ;;  %s4204_s3 = inlined_call_operand.vmem [shape: f32[6,8,34], index: 3, kind: input, shape index: {}]   ;;  %s4205_s5 = inlined_call_operand.vmem [shape: f32[2,4,128], index: 5, kind: output, shape index: {}]  }
   0x1   :  { %v33_v0 = vld [vmem:[%s4200_s0] sm:$0xff]  ;;  %v34_v1 = vld [vmem:[%s4200_s0 + $0x8] sm:$0xff]  ;;  %3691 = vset.pattern.permute.xlu0 %v3757_v2  ;;  %v35_v5 = vld [vmem:[%s4200_s0 + $0x10] sm:$0xff]  ;;  %s3761_s8 = smov 126   ;;  %v3762_v23 = vmov 64   ;;  %s3763_s9 = smov 96  }
   0x2   :  { %v3618_v3 = vpack.c.bf16 %v34_v1, %v33_v0  ;;  %v3822_v4 = vld [vmem:[%s4201_s4] sm:$0xff]  ;;  %v32_v6 = vld [vmem:[%s4201_s4 + $0x8] sm:$0xff]  ;;  %3713 = vset.pattern.permute.xlu1 %v3762_v23  ;;  %s3764_s10 = smov 80   ;;  %vm236_vm2 = vcmask 15360   ;;  %vm336_vm3 = vcmask 1031168   ;;  %v3765_v46 = vmov 65  }
   0x3   :  { %3417 = vmatprep.mubr.msk.f32.mxu0 %vm46_vm0, %v3822_v4  ;;  %38 = vperm.xlu0 %3691, %v3822_v4   ;;  %v3836_v7 = vld [vmem:[%s4202_s2] sm:$0xff]  ;;  %v3844_v8 = vld [vmem:[%s4202_s2 + $0x8] sm:$0xff]  ;;  %v3272_v56 = vld [vmem:[%s4202_s2 + $0x10] sm:$0xff]  ;;  %vm639_vm4 = vcmask 31744   ;;  %vm739_vm5 = vcmask 1014784   ;;  %s3768_s17 = smov 103  }
   0x4   :  { %3619 = vmatprep.subr.bf16.mxu0 %v3618_v3  ;;  %140 = vrot.lane.b32.xlu1 %v3836_v7, %s3758_s30  ;;  %v3903_v57 = vld [vmem:[%s4202_s2 + $0x18] sm:$0xff]  ;;  %v3911_v0 = vld [vmem:[%s4203_s1] ss:$0 sm:$0xff]  ;;  %s3766_s1 = smov 4   ;;  %s3767_s2 = smov 124   ;;  %vm3770_vm6 = vmmov 0  }
   0x5   :  { %3621 = vmatpush3.bf16.msra.mxu0 %v3618_v3  ;;  %s3772_s20 = smov 120   ;;  %s3773_s21 = smov 8   ;;  %vm1020_vm7 = vcmask 64512   ;;  %vm1180_vm8 = vcmask 982016   ;;  %vm1510_vm9 = vcmask 916480   ;;  %vm1754_vm10 = vcmask 1043456  }
   0x6   :  { %3415 = vmatprep.subr.mxu0 %v35_v5  ;;  %s3775_s22 = smov 104   ;;  %s3777_s25 = smov 16  }
   0x7   :  { %43 = vperm.xlu0 %3691, %v32_v6   ;;  %s3778_s28 = smov 86   ;;  %s3780_s29 = smov 77  }
   0x8   :  { %142 = vrot.lane.b32.xlu1 %v3844_v8, %s3758_s30  ;;  %s3782_s15 = smov 72  }
   0x9   :  { %3416 = vmatpush3.msra.mxu0 %v35_v5 }
   0xa   :  { %3418 = vmatmul.mubr.msk.f32.vlgmr.msra.gmra.mrb[0].mxu0 %vm46_vm0, %v32_v6 }
   0xb   :  { %3712 = vset.pattern.permute.xlu0 %v3762_v23 }
  0x76   :  { %v141_v9 = vpop.permute.xlu1 %140 }
  0x77   :  { %3424 = vmatprep.mubr.msk.f32.mxu1 %vm144_vm1, %v141_v9 }
  0x7a   :  { %v143_v21 = vpop.permute.xlu1 %142 }
  0x82   :  { %v39_v10 = vpop.permute.xlu0 %38 }
  0x86   :  { %v44_v11 = vpop.permute.xlu0 %43 }
  0xdd   :  { %v3419_v12 = vpop.f32.mrb[0].mxu0 }
  0xde   :  { %v3849_v13 = vadd.f32 %v3419_v12, %v44_v11  ;;  %v117_v14 = vpop.f32.mrb[1].mxu0 }
  0xdf   :  { %v3851_v15 = vadd.f32 %v117_v14, %v39_v10 }
  0xe0   :  { %v3697_v17 = vpack.i.bf16 %v3849_v13, %v3759_v16  ;;  %v3707_v20 = vpack.i.bf16 %v3759_v16, %v3849_v13 }
  0xe1   :  { %v3692_v18 = vpack.i.bf16 %v3851_v15, %v3759_v16  ;;  %v3622_v19 = vpack.c.bf16 %v3849_v13, %v3851_v15  ;;  %v3702_v22 = vpack.i.bf16 %v3759_v16, %v3851_v15 }
  0xe2   :  { %3698 = vrot.lane.b32.xlu1 %v3697_v17, %s3760_s7 }
  0xe3   :  { %3693 = vrot.lane.b32.xlu0 %v3692_v18, %s3760_s7  ;;  %3623 = vmatprep.subr.bf16.mxu1 %v3622_v19 }
  0xe4   :  { %3625 = vmatpush3.bf16.msra.mxu1 %v3622_v19 }
  0xe6   :  { %3708 = vrot.lane.b32.xlu1 %v3707_v20, %s3761_s8 }
  0xe7   :  { %3703 = vrot.lane.b32.xlu0 %v3702_v22, %s3761_s8  ;;  %3425 = vmatmul.mubr.msk.f32.vlgmr.msra.gmra.mrb[0].mxu1 %vm144_vm1, %v143_v21 }
  0xe8   :  { %3431 = vmatprep.mubr.msk.f32.mxu1 %vm144_vm1, %v3836_v7 }
  0xea   :  { %322 = vrot.lane.b32.xlu1 %v3844_v8, %s3763_s9 }
  0xeb   :  { %320 = vrot.lane.b32.xlu0 %v3836_v7, %s3763_s9 }
  0xee   :  { %427 = vperm.xlu1 %3713, %v3844_v8  }
  0xef   :  { %423 = vperm.xlu0 %3712, %v3836_v7  }
  0xf2   :  { %442 = vrot.lane.b32.xlu1 %v3836_v7, %s3764_s10 }
  0xf3   :  { %444 = vrot.lane.b32.xlu0 %v3844_v8, %s3764_s10  ;;  %3714 = vset.pattern.permute.xlu1 %v3765_v46 }
  0xf4   :  { %3715 = vset.pattern.permute.xlu0 %v3765_v46 }
  0xf6   :  { %435 = vperm.xlu1 %3714, %v3836_v7  }
  0xf7   :  { %439 = vperm.xlu0 %3715, %v3844_v8  }
  0xfa   :  { %3737 = vset.pattern.permute.xlu1 %v3762_v23 }
  0xfb   :  { %3736 = vset.pattern.permute.xlu0 %v3762_v23  ;;  %544 = vrot.lane.b32.xlu1 %v3272_v56, %s3758_s30 }
  0xff   :  { %546 = vrot.lane.b32.xlu1 %v3903_v57, %s3758_s30 }
 0x154   :  { %v3699_v24 = vpop.permute.xlu1 %3698 }
 0x155   :  { %v3701_v25 = vunpack.i.h.bf16 %v3699_v24  ;;  %v3700_v26 = vunpack.i.l.bf16 %v3699_v24  ;;  %v3694_v27 = vpop.permute.xlu0 %3693 }
 0x156   :  { %v3696_v28 = vunpack.i.h.bf16 %v3694_v27  ;;  %v3695_v29 = vunpack.i.l.bf16 %v3694_v27 }
 0x157   :  { %v238_v30 = vsel %vm236_vm2, %v3700_v26, %v3701_v25 }
 0x158   :  { %v3709_v31 = vpop.permute.xlu1 %3708  ;;  %v237_v32 = vsel %vm236_vm2, %v3695_v29, %v3696_v28 }
 0x159   :  { %v3711_v33 = vunpack.i.h.bf16 %v3709_v31  ;;  %v3710_v34 = vunpack.i.l.bf16 %v3709_v31  ;;  %v3704_v35 = vpop.permute.xlu0 %3703  ;;  %v3626_v36 = vpack.c.bf16 %v238_v30, %v237_v32 }
 0x15a   :  { %v3706_v37 = vunpack.i.h.bf16 %v3704_v35  ;;  %v3705_v38 = vunpack.i.l.bf16 %v3704_v35 }
 0x15b   :  { %3627 = vmatprep.subr.bf16.mxu1 %v3626_v36  ;;  %v338_v39 = vsel %vm336_vm3, %v3710_v34, %v3711_v33 }
 0x15c   :  { %3629 = vmatpush3.bf16.msra.mxu1 %v3626_v36  ;;  %v337_v40 = vsel %vm336_vm3, %v3705_v38, %v3706_v37  ;;  %v323_v43 = vpop.permute.xlu1 %322 }
 0x15d   :  { %v3630_v41 = vpack.c.bf16 %v338_v39, %v337_v40  ;;  %v321_v42 = vpop.permute.xlu0 %320 }
 0x15f   :  { %3432 = vmatmul.mubr.msk.f32.vlgmr.msra.gmra.mrb[0].mxu1 %vm144_vm1, %v3844_v8  ;;  %3631 = vmatprep.subr.bf16.mxu1 %v3630_v41 }
 0x160   :  { %3633 = vmatpush3.bf16.msra.mxu1 %v3630_v41  ;;  %3438 = vmatprep.mubr.msk.f32.mxu1 %vm144_vm1, %v321_v42 }
 0x167   :  { %3439 = vmatmul.mubr.msk.f32.vlgmr.msra.gmra.mrb[0].mxu1 %vm144_vm1, %v323_v43 }
 0x16d   :  { %v428_v44 = vpop.permute.xlu1 %427 }
 0x16e   :  { %v424_v47 = vpop.permute.xlu0 %423 }
 0x171   :  { %v443_v45 = vpop.permute.xlu1 %442 }
 0x172   :  { %3445 = vmatprep.mubr.msk.f32.mxu0 %vm144_vm1, %v443_v45  ;;  %v445_v55 = vpop.permute.xlu0 %444 }
 0x175   :  { %v436_v58 = vpop.permute.xlu1 %435 }
 0x176   :  { %v440_v60 = vpop.permute.xlu0 %439 }
 0x179   :  { %v545_v59 = vpop.permute.xlu1 %544 }
 0x17d   :  { %v547_v11 = vpop.permute.xlu1 %546 }
 0x23a   :  { %v3440_v48 = vpop.f32.mrb[0].mxu1 }
 0x23b   :  { %v431_v49 = vadd.f32 %v3440_v48, %v428_v44  ;;  %v411_v50 = vpop.f32.mrb[1].mxu1  ;;  %v1012_v48 = vld [vmem:[%s4204_s3] sm:$0xff] }
 0x23c   :  { %v430_v51 = vadd.f32 %v424_v47, %v411_v50  ;;  %v3771_v47 = vmov 41  }
 0x23d   :  { %v433_v52 = vmax.f32 %v431_v49, 0.0 }
 0x23e   :  { %v432_v53 = vmax.f32 %v430_v51, 0.0 }
 0x240   :  { %v3634_v54 = vpack.c.bf16 %v433_v52, %v432_v53 }
 0x242   :  { %3635 = vmatprep.subr.bf16.mxu0 %v3634_v54 }
 0x243   :  { %3637 = vmatpush3.bf16.msra.mxu0 %v3634_v54 }
 0x246   :  { %3446 = vmatmul.mubr.msk.f32.vlgmr.msra.gmra.mrb[2].mxu0 %vm144_vm1, %v445_v55 }
 0x247   :  { %3452 = vmatprep.mubr.msk.f32.mxu0 %vm144_vm1, %v545_v59 }
 0x319   :  { %v3447_v61 = vpop.f32.mrb[2].mxu0 }
 0x31a   :  { %v522_v62 = vadd.f32 %v3447_v61, %v440_v60  ;;  %v516_v63 = vpop.f32.mrb[3].mxu0  ;;  %v3774_v61 = vmov 32  }
 0x31b   :  { %v517_v1 = vadd.f32 %v516_v63, %v436_v58 }
 0x31c   :  { %v526_v2 = vadd.f32 %v522_v62, %v3849_v13 }
 0x31d   :  { %v525_v3 = vadd.f32 %v517_v1, %v3851_v15 }
 0x31e   :  { %v3916_v5 = vmul.f32 %v3911_v0, %v526_v2 }
 0x31f   :  { %v3919_v6 = vmul.f32 %v3911_v0, %v525_v3 }
 0x320   :  { %v3721_v7 = vpack.i.bf16 %v3916_v5, %v3759_v16  ;;  %v3731_v10 = vpack.i.bf16 %v3759_v16, %v3916_v5 }
 0x321   :  { %v3716_v8 = vpack.i.bf16 %v3919_v6, %v3759_v16  ;;  %v3638_v9 = vpack.c.bf16 %v3916_v5, %v3919_v6  ;;  %v3726_v12 = vpack.i.bf16 %v3759_v16, %v3919_v6 }
 0x322   :  { %3722 = vrot.lane.b32.xlu1 %v3721_v7, %s3766_s1 }
 0x323   :  { %3717 = vrot.lane.b32.xlu0 %v3716_v8, %s3766_s1  ;;  %3639 = vmatprep.subr.bf16.mxu0 %v3638_v9 }
 0x324   :  { %3641 = vmatpush3.bf16.msra.mxu0 %v3638_v9 }
 0x326   :  { %3732 = vrot.lane.b32.xlu1 %v3731_v10, %s3767_s2 }
 0x327   :  { %3727 = vrot.lane.b32.xlu0 %v3726_v12, %s3767_s2  ;;  %3453 = vmatmul.mubr.msk.f32.vlgmr.msra.gmra.mrb[4].mxu0 %vm144_vm1, %v547_v11 }
 0x328   :  { %3459 = vmatprep.mubr.msk.f32.mxu0 %vm144_vm1, %v3272_v56 }
 0x32a   :  { %725 = vrot.lane.b32.xlu1 %v3903_v57, %s3763_s9 }
 0x32b   :  { %723 = vrot.lane.b32.xlu0 %v3272_v56, %s3763_s9 }
 0x32e   :  { %830 = vperm.xlu1 %3737, %v3903_v57  }
 0x32f   :  { %826 = vperm.xlu0 %3736, %v3272_v56  }
 0x332   :  { %845 = vrot.lane.b32.xlu1 %v3272_v56, %s3764_s10 }
 0x333   :  { %847 = vrot.lane.b32.xlu0 %v3903_v57, %s3764_s10  ;;  %3738 = vset.pattern.permute.xlu1 %v3765_v46 }
 0x334   :  { %3739 = vset.pattern.permute.xlu0 %v3765_v46  ;;  %v3769_v46 = vmov 0.0|0.0  }
 0x336   :  { %838 = vperm.xlu1 %3738, %v3272_v56  }
 0x337   :  { %842 = vperm.xlu0 %3739, %v3903_v57  }
 0x33a   :  { %938 = vrot.lane.b32.xlu1 %v3822_v4, %s3768_s17 }
 0x33b   :  { %3740 = vset.pattern.permute.xlu1 %v3771_v47  ;;  %1018 = vrot.lane.b32.xlu0 %v1012_v48, %s3772_s20 }
 0x33c   :  { %3741 = vset.pattern.permute.xlu0 %v3774_v61 }
 0x33e   :  { %935 = vperm.xlu1 %3740, %v3822_v4  }
 0x342   :  { %1095 = vrot.lane.b32.xlu1 %v3759_v16, %s3773_s21 }
 0x394   :  { %v3723_v13 = vpop.permute.xlu1 %3722 }
 0x395   :  { %v3725_v14 = vunpack.i.h.bf16 %v3723_v13  ;;  %v3724_v15 = vunpack.i.l.bf16 %v3723_v13  ;;  %v3718_v17 = vpop.permute.xlu0 %3717  ;;  %v3776_v13 = vmov 33  }
 0x396   :  { %v3720_v18 = vunpack.i.h.bf16 %v3718_v17  ;;  %v3719_v19 = vunpack.i.l.bf16 %v3718_v17  ;;  %3742 = vset.pattern.permute.xlu1 %v3776_v13 }
 0x397   :  { %v641_v20 = vsel %vm639_vm4, %v3724_v15, %v3725_v14 }
 0x398   :  { %v3733_v21 = vpop.permute.xlu1 %3732  ;;  %v640_v22 = vsel %vm639_vm4, %v3719_v19, %v3720_v18 }
 0x399   :  { %v3735_v24 = vunpack.i.h.bf16 %v3733_v21  ;;  %v3734_v25 = vunpack.i.l.bf16 %v3733_v21  ;;  %v3728_v26 = vpop.permute.xlu0 %3727  ;;  %v3642_v27 = vpack.c.bf16 %v641_v20, %v640_v22 }
 0x39a   :  { %v3730_v28 = vunpack.i.h.bf16 %v3728_v26  ;;  %v3729_v29 = vunpack.i.l.bf16 %v3728_v26 }
 0x39b   :  { %3643 = vmatprep.subr.bf16.mxu0 %v3642_v27  ;;  %v741_v30 = vsel %vm739_vm5, %v3734_v25, %v3735_v24 }
 0x39c   :  { %3645 = vmatpush3.bf16.msra.mxu0 %v3642_v27  ;;  %v740_v31 = vsel %vm739_vm5, %v3729_v29, %v3730_v28  ;;  %v726_v34 = vpop.permute.xlu1 %725  ;;  %v3287_v27 = vld [vmem:[%s4204_s3 + $0x8] sm:$0xff] }
 0x39d   :  { %v3646_v32 = vpack.c.bf16 %v741_v30, %v740_v31  ;;  %v724_v33 = vpop.permute.xlu0 %723 }
 0x39f   :  { %3460 = vmatmul.mubr.msk.f32.vlgmr.msra.gmra.mrb[4].mxu0 %vm144_vm1, %v3903_v57  ;;  %3647 = vmatprep.subr.bf16.mxu0 %v3646_v32 }
 0x3a0   :  { %3649 = vmatpush3.bf16.msra.mxu0 %v3646_v32  ;;  %3466 = vmatprep.mubr.msk.f32.mxu0 %vm144_vm1, %v724_v33 }
 0x3a1   :  { %3488 = vmatprep.subr.mxu0 %v3759_v16 }
 0x3a7   :  { %3467 = vmatmul.mubr.msk.f32.vlgmr.msra.gmra.mrb[4].mxu0 %vm144_vm1, %v726_v34 }
 0x3a8   :  { %3490 = vmatprep.mubr.msk.f32.mxu0 %vm3770_vm6, %v3759_v16 }
 0x3ad   :  { %v831_v35 = vpop.permute.xlu1 %830 }
 0x3ae   :  { %v827_v37 = vpop.permute.xlu0 %826 }
 0x3b1   :  { %v846_v36 = vpop.permute.xlu1 %845 }
 0x3b2   :  { %3473 = vmatprep.mubr.msk.f32.mxu1 %vm144_vm1, %v846_v36  ;;  %v848_v45 = vpop.permute.xlu0 %847 }
 0x3b5   :  { %v839_v50 = vpop.permute.xlu1 %838 }
 0x3b6   :  { %v843_v49 = vpop.permute.xlu0 %842 }
 0x3b9   :  { %v939_v60 = vpop.permute.xlu1 %938 }
 0x3ba   :  { %v1019_v3 = vpop.permute.xlu0 %1018 }
 0x3bd   :  { %v936_v62 = vpop.permute.xlu1 %935 }
 0x47a   :  { %v3468_v38 = vpop.f32.mrb[4].mxu0 }
 0x47b   :  { %v834_v39 = vadd.f32 %v3468_v38, %v831_v35  ;;  %v814_v40 = vpop.f32.mrb[5].mxu0 }
 0x47c   :  { %v833_v41 = vadd.f32 %v827_v37, %v814_v40 }
 0x47d   :  { %v836_v42 = vmax.f32 %v834_v39, 0.0 }
 0x47e   :  { %v835_v43 = vmax.f32 %v833_v41, 0.0 }
 0x480   :  { %v3650_v44 = vpack.c.bf16 %v836_v42, %v835_v43  ;;  %v1672_v42 = vld [vmem:[%s4201_s4] sm:$0xf] }
 0x482   :  { %3651 = vmatprep.subr.bf16.mxu1 %v3650_v44 }
 0x483   :  { %3653 = vmatpush3.bf16.msra.mxu1 %v3650_v44 }
 0x484   :  { %3654 = vmatprep.subr.bf16.mxu1 %v3769_v46 }
 0x486   :  { %3474 = vmatmul.mubr.msk.f32.vlgmr.msra.gmra.mrb[2].mxu1 %vm144_vm1, %v848_v45 }
 0x487   :  { %3480 = vmatprep.mubr.msk.f32.mxu1 %vm3770_vm6, %v3759_v16 }
 0x559   :  { %v3475_v51 = vpop.f32.mrb[2].mxu1 }
 0x55a   :  { %v925_v52 = vadd.f32 %v3475_v51, %v843_v49  ;;  %v919_v53 = vpop.f32.mrb[3].mxu1 }
 0x55b   :  { %v920_v54 = vadd.f32 %v919_v53, %v839_v50 }
 0x55c   :  { %v929_v55 = vadd.f32 %v925_v52, %v3916_v5  ;;  %v1096_v5 = vpop.permute.xlu1 %1095 }
 0x55d   :  { %v928_v56 = vadd.f32 %v920_v54, %v3919_v6 }
 0x55e   :  { %v931_v57 = vmul.f32 %v3911_v0, %v929_v55  ;;  %v3779_v55 = vmov 50  }
 0x55f   :  { %v930_v58 = vmul.f32 %v3911_v0, %v928_v56 }
 0x561   :  { %v3655_v59 = vpack.c.bf16 %v931_v57, %v930_v58 }
 0x563   :  { %3656 = vmatpush3.bf16.msra.mxu1 %v3655_v59 }
 0x564   :  { %3483 = vmatprep.subr.mxu1 %v3759_v16 }
 0x566   :  { %3481 = vmatmul.mubr.msk.f32.vlgmr.msra.gmra.mrb[4].mxu1 %vm144_vm1, %v939_v60 }
 0x567   :  { %3485 = vmatprep.mubr.msk.f32.mxu1 %vm3770_vm6, %v3759_v16 }
 0x639   :  { %v1008_v63 = vpop.f32.mrb[4].mxu1 }
 0x63a   :  { %v1009_v1 = vadd.f32 %v1008_v63, %v936_v62  ;;  %v3482_v2 = vpop.f32.mrb[5].mxu1 }
 0x63b   :  { %v3781_v2 = vmov 55  }
 0x63c   :  { %1097 = vrot.lane.b32.xlu0 %v1009_v1, %s3773_s21  ;;  %1176 = vrot.lane.b32.xlu1 %v1009_v1, %s3772_s20 }
 0x63d   :  { %3484 = vmatpush3.msra.mxu1 %v1009_v1 }
 0x63e   :  { %3486 = vmatmul.mubr.msk.f32.vlgmr.msra.gmra.mrb[6].mxu1 %vm1020_vm7, %v1019_v3  ;;  %3493 = vmatprep.subr.mxu1 %v3759_v16 }
 0x63f   :  { %3495 = vmatprep.mubr.msk.f32.mxu1 %vm3770_vm6, %v3759_v16 }
 0x640   :  { %1178 = vrot.lane.b32.xlu0 %v3759_v16, %s3772_s20  ;;  %1173 = vrot.lane.b32.xlu1 %v1012_v48, %s3758_s30 }
 0x644   :  { %1257 = vperm.xlu0 %3741, %v1012_v48   ;;  %1266 = vrot.lane.b32.xlu1 %v1012_v48, %s3775_s22 }
 0x648   :  { %1263 = vperm.xlu1 %3742, %v1012_v48   ;;  %1349 = vrot.lane.b32.xlu0 %v3287_v27, %s3772_s20 }
 0x64c   :  { %1425 = vrot.lane.b32.xlu1 %v3759_v16, %s3777_s25 }
 0x64d   :  { %3744 = vset.pattern.permute.xlu1 %v3779_v55 }
 0x6ae   :  { %v1098_v6 = vpop.permute.xlu0 %1097  ;;  %v1177_v7 = vpop.permute.xlu1 %1176 }
 0x6af   :  { %v1099_v8 = vsel %vm1020_vm7, %v1096_v5, %v1098_v6 }
 0x6b0   :  { %3489 = vmatpush3.msra.mxu0 %v1099_v8 }
 0x6b1   :  { %3491 = vmatmul.mubr.msk.f32.vlgmr.msra.gmra.mrb[6].mxu0 %vm1020_vm7, %v1012_v48  ;;  %3498 = vmatprep.subr.mxu0 %v3759_v16 }
 0x6b2   :  { %v1179_v9 = vpop.permute.xlu0 %1178  ;;  %v1174_v10 = vpop.permute.xlu1 %1173  ;;  %3500 = vmatprep.mubr.msk.f32.mxu0 %vm3770_vm6, %v3759_v16 }
 0x6b3   :  { %v1181_v11 = vsel %vm1180_vm8, %v1177_v7, %v1179_v9 }
 0x6b4   :  { %3494 = vmatpush3.msra.mxu1 %v1181_v11 }
 0x6b5   :  { %3496 = vmatmul.mubr.msk.f32.vlgmr.msra.gmra.mrb[8].mxu1 %vm1020_vm7, %v1174_v10  ;;  %3503 = vmatprep.subr.mxu1 %v3759_v16 }
 0x6b6   :  { %3505 = vmatprep.mubr.msk.f32.mxu1 %vm3770_vm6, %v3759_v16  ;;  %v1267_v26 = vpop.permute.xlu1 %1266 }
 0x6c3   :  { %v1258_v20 = vpop.permute.xlu0 %1257 }
 0x6c7   :  { %v1264_v28 = vpop.permute.xlu1 %1263  ;;  %v1350_v34 = vpop.permute.xlu0 %1349 }
 0x6cb   :  { %v1426_v35 = vpop.permute.xlu1 %1425 }
 0x711   :  { %v1089_v12 = vpop.f32.mrb[6].mxu1 }
 0x712   :  { %v3487_v14 = vpop.f32.mrb[7].mxu1 }
 0x784   :  { %v1169_v15 = vpop.f32.mrb[6].mxu0 }
 0x785   :  { %v1170_v17 = vadd.f32 %v1169_v15, %v1089_v12  ;;  %v3492_v18 = vpop.f32.mrb[7].mxu0 }
 0x788   :  { %v1251_v19 = vpop.f32.mrb[8].mxu1 }
 0x789   :  { %v1255_v21 = vadd.f32 %v1251_v19, %v1170_v17  ;;  %v3497_v22 = vpop.f32.mrb[9].mxu1 }
 0x78b   :  { %v1260_v24 = vadd.f32 %v1258_v20, %v1255_v21 }
 0x78d   :  { %v1261_v25 = vmax.f32 %v1260_v24, 0.0 }
 0x78f   :  { %3499 = vmatpush3.msra.mxu0 %v1261_v25 }
 0x790   :  { %3501 = vmatmul.mubr.msk.f32.vlgmr.msra.gmra.mrb[8].mxu0 %vm1020_vm7, %v1267_v26  ;;  %3508 = vmatprep.subr.mxu0 %v3759_v16 }
 0x791   :  { %3510 = vmatprep.mubr.msk.f32.mxu0 %vm3770_vm6, %v3759_v16 }
 0x863   :  { %v1336_v29 = vpop.f32.mrb[8].mxu0 }
 0x864   :  { %v1337_v30 = vadd.f32 %v1336_v29, %v1264_v28  ;;  %v3502_v31 = vpop.f32.mrb[9].mxu0 }
 0x866   :  { %v1340_v32 = vadd.f32 %v1337_v30, %v1009_v1  ;;  %v4047_v1 = vld [vmem:[%s4204_s3 + $0x10] sm:$0xff] }
 0x868   :  { %v1341_v33 = vmul.f32 %v3911_v0, %v1340_v32 }
 0x86a   :  { %1506 = vrot.lane.b32.xlu1 %v1341_v33, %s3758_s30  ;;  %1427 = vrot.lane.b32.xlu0 %v1341_v33, %s3777_s25 }
 0x86b   :  { %3504 = vmatpush3.msra.mxu1 %v1341_v33 }
 0x86c   :  { %3506 = vmatmul.mubr.msk.f32.vlgmr.msra.gmra.mrb[10].mxu1 %vm1020_vm7, %v1350_v34  ;;  %3513 = vmatprep.subr.mxu1 %v3759_v16 }
 0x86d   :  { %3515 = vmatprep.mubr.msk.f32.mxu1 %vm3770_vm6, %v3759_v16 }
 0x86e   :  { %1508 = vrot.lane.b32.xlu0 %v3759_v16, %s3758_s30  ;;  %1503 = vrot.lane.b32.xlu1 %v3287_v27, %s3758_s30 }
 0x872   :  { %1587 = vperm.xlu0 %3741, %v3287_v27   ;;  %1596 = vrot.lane.b32.xlu1 %v3287_v27, %s3775_s22 }
 0x876   :  { %3743 = vset.pattern.permute.xlu0 %v3776_v13  ;;  %1678 = vrot.lane.b32.xlu1 %v1672_v42, %s3778_s28 }
 0x877   :  { %1593 = vperm.xlu0 %3743, %v3287_v27  }
 0x87a   :  { %1675 = vperm.xlu1 %3744, %v1672_v42  }
 0x87b   :  { %3746 = vset.pattern.permute.xlu0 %v3774_v61 }
 0x87c   :  { %1781 = vrot.lane.b32.xlu0 %v3822_v4, %s3780_s29 }
 0x87e   :  { %3745 = vset.pattern.permute.xlu1 %v3781_v2 }
 0x87f   :  { %1778 = vperm.xlu1 %3745, %v3822_v4  }
 0x880   :  { %1865 = vrot.lane.b32.xlu0 %v4047_v1, %s3772_s20 }
 0x883   :  { %1941 = vrot.lane.b32.xlu1 %v3759_v16, %s3760_s7 }
 0x884   :  { %3747 = vset.pattern.permute.xlu1 %v3776_v13 }
 0x8dc   :  { %v1507_v36 = vpop.permute.xlu1 %1506  ;;  %v1428_v37 = vpop.permute.xlu0 %1427 }
 0x8dd   :  { %v1429_v38 = vsel %vm144_vm1, %v1426_v35, %v1428_v37 }
 0x8de   :  { %3509 = vmatpush3.msra.mxu0 %v1429_v38 }
 0x8df   :  { %3511 = vmatmul.mubr.msk.f32.vlgmr.msra.gmra.mrb[10].mxu0 %vm1020_vm7, %v3287_v27  ;;  %3518 = vmatprep.subr.mxu0 %v3759_v16 }
 0x8e0   :  { %v1509_v39 = vpop.permute.xlu0 %1508  ;;  %v1504_v40 = vpop.permute.xlu1 %1503  ;;  %3520 = vmatprep.mubr.msk.f32.mxu0 %vm3770_vm6, %v3759_v16 }
 0x8e1   :  { %v1511_v41 = vsel %vm1510_vm9, %v1507_v36, %v1509_v39 }
 0x8e2   :  { %3514 = vmatpush3.msra.mxu1 %v1511_v41 }
 0x8e3   :  { %3516 = vmatmul.mubr.msk.f32.vlgmr.msra.gmra.mrb[12].mxu1 %vm1020_vm7, %v1504_v40  ;;  %3523 = vmatprep.subr.mxu1 %v3759_v16 }
 0x8e4   :  { %3525 = vmatprep.mubr.msk.f32.mxu1 %vm3770_vm6, %v3759_v16  ;;  %v1597_v54 = vpop.permute.xlu1 %1596 }
 0x8e8   :  { %v1679_v63 = vpop.permute.xlu1 %1678 }
 0x8f1   :  { %v1588_v51 = vpop.permute.xlu0 %1587 }
 0x8f6   :  { %v1594_v56 = vpop.permute.xlu0 %1593 }
 0x8f9   :  { %v1676_v3 = vpop.permute.xlu1 %1675 }
 0x8fa   :  { %v1782_v30 = vpop.permute.xlu0 %1781 }
 0x8fe   :  { %v1779_v32 = vpop.permute.xlu1 %1778  ;;  %v1866_v36 = vpop.permute.xlu0 %1865 }
 0x902   :  { %v1942_v37 = vpop.permute.xlu1 %1941 }
 0x93f   :  { %v1419_v43 = vpop.f32.mrb[10].mxu1 }
 0x940   :  { %v3507_v44 = vpop.f32.mrb[11].mxu1 }
 0x9b2   :  { %v1499_v45 = vpop.f32.mrb[10].mxu0 }
 0x9b3   :  { %v1500_v46 = vadd.f32 %v1499_v45, %v1419_v43  ;;  %v3512_v47 = vpop.f32.mrb[11].mxu0 }
 0x9b6   :  { %v1581_v48 = vpop.f32.mrb[12].mxu1 }
 0x9b7   :  { %v1585_v49 = vadd.f32 %v1581_v48, %v1500_v46  ;;  %v3517_v50 = vpop.f32.mrb[13].mxu1 }
 0x9b9   :  { %v1590_v52 = vadd.f32 %v1588_v51, %v1585_v49 }
 0x9bb   :  { %v1591_v53 = vmax.f32 %v1590_v52, 0.0 }
 0x9bd   :  { %3519 = vmatpush3.msra.mxu0 %v1591_v53 }
 0x9be   :  { %3521 = vmatmul.mubr.msk.f32.vlgmr.msra.gmra.mrb[12].mxu0 %vm1020_vm7, %v1597_v54  ;;  %3528 = vmatprep.subr.mxu0 %v3759_v16 }
 0x9bf   :  { %3530 = vmatprep.mubr.msk.f32.mxu0 %vm3770_vm6, %v3759_v16 }
 0xa91   :  { %v1666_v57 = vpop.f32.mrb[12].mxu0 }
 0xa92   :  { %v1667_v58 = vadd.f32 %v1666_v57, %v1594_v56  ;;  %v3522_v59 = vpop.f32.mrb[13].mxu0  ;;  %v3300_v56 = vld [vmem:[%s4204_s3 + $0x18] sm:$0xff] }
 0xa94   :  { %v1670_v60 = vadd.f32 %v1667_v58, %v1341_v33 }
 0xa96   :  { %v1671_v62 = vmul.f32 %v3911_v0, %v1670_v60 }
 0xa98   :  { %3524 = vmatpush3.msra.mxu1 %v1671_v62 }
 0xa99   :  { %3526 = vmatmul.mubr.msk.f32.vlgmr.msra.gmra.mrb[14].mxu1 %vm1020_vm7, %v1679_v63  ;;  %3533 = vmatprep.subr.mxu1 %v3759_v16 }
 0xa9a   :  { %3535 = vmatprep.mubr.msk.f32.mxu1 %vm3770_vm6, %v3759_v16 }
 0xb6c   :  { %v1748_v5 = vpop.f32.mrb[14].mxu1 }
 0xb6d   :  { %v1749_v6 = vadd.f32 %v1748_v5, %v1676_v3  ;;  %v3527_v7 = vpop.f32.mrb[15].mxu1 }
 0xb6f   :  { %v1752_v8 = vmul.f32 %v3911_v0, %v1749_v6 }
 0xb71   :  { %v1755_v9 = vsel %vm1754_vm10, %v1752_v8, -inf  ;;  %1753 = vst [vmem:[%s4205_s5] sm:$0xf] %v1752_v8 }
 0xb72   :  { %v1756_v10 = vrot.slane %v1755_v9, 4 }
 0xb74   :  { %v1757_v4 = vmax.f32 %v1755_v9, %v1756_v10 }
 0xb76   :  { %v1758_v11 = vrot.slane %v1757_v4, 2 }
 0xb78   :  { %v1759_v12 = vmax.f32 %v1757_v4, %v1758_v11 }
 0xb7a   :  { %v1760_v14 = vrot.slane %v1759_v12, 1 }
 0xb7c   :  { %v1761_v15 = vmax.f32 %v1759_v12, %v1760_v14 }
 0xb7e   :  { %v1762_v17 = vsub.f32 %v1752_v8, %v1761_v15 }
 0xb80   :  { %v1763_v18 = vmul.f32 1.442695, %v1762_v17 }
 0xb82   :  { %3753 = vpow2.f32 %v1763_v18 }
 0xb8c   :  { %v3754_v19 = vpop.eup %3753 }
 0xb8d   :  { %v1765_v20 = vsel %vm1754_vm10, %v3754_v19, 0.0 }
 0xb8e   :  { %v1766_v21 = vrot.slane %v1765_v20, 4 }
 0xb90   :  { %v1767_v22 = vadd.f32 %v1766_v21, %v1765_v20 }
 0xb92   :  { %v1768_v24 = vrot.slane %v1767_v22, 2 }
 0xb94   :  { %v1769_v25 = vadd.f32 %v1768_v24, %v1767_v22 }
 0xb96   :  { %v1770_v26 = vrot.slane %v1769_v25, 1 }
 0xb98   :  { %v1771_v27 = vadd.f32 %v1770_v26, %v1769_v25 }
 0xb9a   :  { %3755 = vrcp.f32 %v1771_v27 }
 0xba4   :  { %v3756_v28 = vpop.eup %3755 }
 0xba5   :  { %v1773_v29 = vmul.f32 %v3756_v28, %v3754_v19 }
 0xba7   :  { %v1774_v31 = vmul.f32 %v3911_v0, %v1773_v29 }
 0xba9   :  { %3529 = vmatpush3.msk.msra.mxu0 %vm1754_vm10, %v1774_v31 }
 0xbaa   :  { %3531 = vmatmul.mubr.msk.f32.vlgmr.msra.gmra.mrb[14].mxu0 %vm639_vm4, %v1782_v30  ;;  %3538 = vmatprep.subr.mxu0 %v3759_v16 }
 0xbab   :  { %3540 = vmatprep.mubr.msk.f32.mxu0 %vm3770_vm6, %v3759_v16 }
 0xc7d   :  { %v1854_v33 = vpop.f32.mrb[14].mxu0 }
 0xc7e   :  { %v1855_v34 = vadd.f32 %v1854_v33, %v1779_v32  ;;  %v3532_v35 = vpop.f32.mrb[15].mxu0 }
 0xc80   :  { %1943 = vrot.lane.b32.xlu0 %v1855_v34, %s3760_s7  ;;  %2022 = vrot.lane.b32.xlu1 %v1855_v34, %s3761_s8 }
 0xc81   :  { %3534 = vmatpush3.msra.mxu1 %v1855_v34 }
 0xc82   :  { %3536 = vmatmul.mubr.msk.f32.vlgmr.msra.gmra.mrb[16].mxu1 %vm1020_vm7, %v1866_v36  ;;  %3543 = vmatprep.subr.mxu1 %v3759_v16 }
 0xc83   :  { %3545 = vmatprep.mubr.msk.f32.mxu1 %vm3770_vm6, %v3759_v16 }
 0xc84   :  { %2024 = vrot.lane.b32.xlu0 %v3759_v16, %s3761_s8  ;;  %2019 = vrot.lane.b32.xlu1 %v4047_v1, %s3758_s30 }
 0xc88   :  { %2102 = vperm.xlu0 %3746, %v4047_v1   ;;  %2111 = vrot.lane.b32.xlu1 %v4047_v1, %s3775_s22 }
 0xc8c   :  { %2108 = vperm.xlu1 %3747, %v4047_v1   ;;  %2194 = vrot.lane.b32.xlu0 %v3300_v56, %s3772_s20 }
 0xc90   :  { %2270 = vrot.lane.b32.xlu1 %v3759_v16, %s3766_s1 }
 0xcf2   :  { %v1944_v38 = vpop.permute.xlu0 %1943  ;;  %v2023_v39 = vpop.permute.xlu1 %2022 }
 0xcf3   :  { %v1945_v40 = vsel %vm236_vm2, %v1942_v37, %v1944_v38 }
 0xcf4   :  { %3539 = vmatpush3.msra.mxu0 %v1945_v40 }
 0xcf5   :  { %3541 = vmatmul.mubr.msk.f32.vlgmr.msra.gmra.mrb[16].mxu0 %vm1020_vm7, %v4047_v1  ;;  %3548 = vmatprep.subr.mxu0 %v3759_v16 }
 0xcf6   :  { %v2025_v41 = vpop.permute.xlu0 %2024  ;;  %v2020_v42 = vpop.permute.xlu1 %2019  ;;  %3550 = vmatprep.mubr.msk.f32.mxu0 %vm3770_vm6, %v3759_v16 }
 0xcf7   :  { %v2026_v43 = vsel %vm336_vm3, %v2023_v39, %v2025_v41 }
 0xcf8   :  { %3544 = vmatpush3.msra.mxu1 %v2026_v43 }
 0xcf9   :  { %3546 = vmatmul.mubr.msk.f32.vlgmr.msra.gmra.mrb[18].mxu1 %vm1020_vm7, %v2020_v42  ;;  %3553 = vmatprep.subr.mxu1 %v3759_v16 }
 0xcfa   :  { %3555 = vmatprep.mubr.msk.f32.mxu1 %vm3770_vm6, %v3759_v16  ;;  %v2112_v55 = vpop.permute.xlu1 %2111 }
 0xd07   :  { %v2103_v50 = vpop.permute.xlu0 %2102 }
 0xd0b   :  { %v2109_v57 = vpop.permute.xlu1 %2108  ;;  %v2195_v1 = vpop.permute.xlu0 %2194 }
 0xd0f   :  { %v2271_v2 = vpop.permute.xlu1 %2270 }
 0xd55   :  { %v1935_v44 = vpop.f32.mrb[16].mxu1 }
 0xd56   :  { %v3537_v45 = vpop.f32.mrb[17].mxu1 }
 0xdc8   :  { %v2015_v46 = vpop.f32.mrb[16].mxu0 }
 0xdc9   :  { %v2016_v47 = vadd.f32 %v2015_v46, %v1935_v44  ;;  %v3542_v48 = vpop.f32.mrb[17].mxu0 }
 0xdcc   :  { %v2096_v49 = vpop.f32.mrb[18].mxu1 }
 0xdcd   :  { %v2100_v51 = vadd.f32 %v2096_v49, %v2016_v47  ;;  %v3547_v52 = vpop.f32.mrb[19].mxu1 }
 0xdcf   :  { %v2105_v53 = vadd.f32 %v2103_v50, %v2100_v51  ;;  %v3310_v50 = vld [vmem:[%s4204_s3 + $0x28] sm:$0xff] }
 0xdd1   :  { %v2106_v54 = vmax.f32 %v2105_v53, 0.0 }
 0xdd3   :  { %3549 = vmatpush3.msra.mxu0 %v2106_v54 }
 0xdd4   :  { %3551 = vmatmul.mubr.msk.f32.vlgmr.msra.gmra.mrb[18].mxu0 %vm1020_vm7, %v2112_v55  ;;  %3558 = vmatprep.subr.mxu0 %v3759_v16 }
 0xdd5   :  { %3560 = vmatprep.mubr.msk.f32.mxu0 %vm3770_vm6, %v3759_v16 }
 0xea7   :  { %v2181_v58 = vpop.f32.mrb[18].mxu0 }
 0xea8   :  { %v2182_v59 = vadd.f32 %v2181_v58, %v2109_v57  ;;  %v3552_v60 = vpop.f32.mrb[19].mxu0 }
 0xeaa   :  { %v2185_v62 = vadd.f32 %v2182_v59, %v1855_v34 }
 0xeac   :  { %v2186_v63 = vmul.f32 %v3911_v0, %v2185_v62 }
 0xeae   :  { %2351 = vrot.lane.b32.xlu1 %v2186_v63, %s3767_s2  ;;  %2272 = vrot.lane.b32.xlu0 %v2186_v63, %s3766_s1 }
 0xeaf   :  { %3554 = vmatpush3.msra.mxu1 %v2186_v63 }
 0xeb0   :  { %3556 = vmatmul.mubr.msk.f32.vlgmr.msra.gmra.mrb[20].mxu1 %vm1020_vm7, %v2195_v1  ;;  %3563 = vmatprep.subr.mxu1 %v3759_v16 }
 0xeb1   :  { %3565 = vmatprep.mubr.msk.f32.mxu1 %vm3770_vm6, %v3759_v16 }
 0xeb2   :  { %2353 = vrot.lane.b32.xlu0 %v3759_v16, %s3767_s2  ;;  %2348 = vrot.lane.b32.xlu1 %v3300_v56, %s3758_s30 }
 0xeb6   :  { %2431 = vperm.xlu0 %3746, %v3300_v56   ;;  %2440 = vrot.lane.b32.xlu1 %v3300_v56, %s3775_s22 }
 0xeba   :  { %3748 = vset.pattern.permute.xlu0 %v3776_v13 }
 0xebb   :  { %2437 = vperm.xlu0 %3748, %v3300_v56  }
 0xebf   :  { %3749 = vset.pattern.permute.xlu0 %v3774_v61  ;;  %v3305_v61 = vld [vmem:[%s4204_s3 + $0x20] sm:$0xff] }
 0xec0   :  { %2523 = vrot.lane.b32.xlu1 %v3305_v61, %s3772_s20 }
 0xec4   :  { %2599 = vrot.lane.b32.xlu1 %v3759_v16, %s3773_s21 }
 0xf20   :  { %v2352_v3 = vpop.permute.xlu1 %2351  ;;  %v2273_v5 = vpop.permute.xlu0 %2272 }
 0xf21   :  { %v2274_v6 = vsel %vm639_vm4, %v2271_v2, %v2273_v5 }
 0xf22   :  { %3559 = vmatpush3.msra.mxu0 %v2274_v6 }
 0xf23   :  { %3561 = vmatmul.mubr.msk.f32.vlgmr.msra.gmra.mrb[20].mxu0 %vm1020_vm7, %v3300_v56  ;;  %3568 = vmatprep.subr.mxu0 %v3759_v16 }
 0xf24   :  { %v2354_v7 = vpop.permute.xlu0 %2353  ;;  %v2349_v8 = vpop.permute.xlu1 %2348  ;;  %3570 = vmatprep.mubr.msk.f32.mxu0 %vm3770_vm6, %v3759_v16 }
 0xf25   :  { %v2355_v9 = vsel %vm739_vm5, %v2352_v3, %v2354_v7 }
 0xf26   :  { %3564 = vmatpush3.msra.mxu1 %v2355_v9 }
 0xf27   :  { %3566 = vmatmul.mubr.msk.f32.vlgmr.msra.gmra.mrb[22].mxu1 %vm1020_vm7, %v2349_v8  ;;  %3573 = vmatprep.subr.mxu1 %v3759_v16 }
 0xf28   :  { %3575 = vmatprep.mubr.msk.f32.mxu1 %vm3770_vm6, %v3759_v16  ;;  %v2441_v22 = vpop.permute.xlu1 %2440 }
 0xf32   :  { %v2524_v30 = vpop.permute.xlu1 %2523 }
 0xf35   :  { %v2432_v19 = vpop.permute.xlu0 %2431 }
 0xf36   :  { %v2600_v31 = vpop.permute.xlu1 %2599 }
 0xf3a   :  { %v2438_v24 = vpop.permute.xlu0 %2437 }
 0xf83   :  { %v2264_v10 = vpop.f32.mrb[20].mxu1 }
 0xf84   :  { %v3557_v4 = vpop.f32.mrb[21].mxu1 }
 0xff6   :  { %v2344_v11 = vpop.f32.mrb[20].mxu0 }
 0xff7   :  { %v2345_v12 = vadd.f32 %v2344_v11, %v2264_v10  ;;  %v3562_v14 = vpop.f32.mrb[21].mxu0 }
 0xffa   :  { %v2425_v15 = vpop.f32.mrb[22].mxu1 }
 0xffb   :  { %v2429_v17 = vadd.f32 %v2425_v15, %v2345_v12  ;;  %v3567_v18 = vpop.f32.mrb[23].mxu1 }
 0xffd   :  { %v2434_v20 = vadd.f32 %v2432_v19, %v2429_v17 }
 0xfff   :  { %v2435_v21 = vmax.f32 %v2434_v20, 0.0 }
0x1001   :  { %3569 = vmatpush3.msra.mxu0 %v2435_v21 }
0x1002   :  { %3571 = vmatmul.mubr.msk.f32.vlgmr.msra.gmra.mrb[22].mxu0 %vm1020_vm7, %v2441_v22  ;;  %3578 = vmatprep.subr.mxu0 %v3759_v16 }
0x1003   :  { %3580 = vmatprep.mubr.msk.f32.mxu0 %vm3770_vm6, %v3759_v16 }
0x10d5   :  { %v2510_v25 = vpop.f32.mrb[22].mxu0 }
0x10d6   :  { %v2511_v26 = vadd.f32 %v2510_v25, %v2438_v24  ;;  %v3572_v27 = vpop.f32.mrb[23].mxu0 }
0x10d8   :  { %v2514_v28 = vadd.f32 %v2511_v26, %v2186_v63 }
0x10da   :  { %v2515_v29 = vmul.f32 %v3911_v0, %v2514_v28 }
0x10dc   :  { %2680 = vrot.lane.b32.xlu1 %v2515_v29, %s3772_s20  ;;  %2601 = vrot.lane.b32.xlu0 %v2515_v29, %s3773_s21 }
0x10dd   :  { %3574 = vmatpush3.msra.mxu1 %v2515_v29 }
0x10de   :  { %3576 = vmatmul.mubr.msk.f32.vlgmr.msra.gmra.mrb[24].mxu1 %vm1020_vm7, %v2524_v30  ;;  %3583 = vmatprep.subr.mxu1 %v3759_v16 }
0x10df   :  { %3585 = vmatprep.mubr.msk.f32.mxu1 %vm3770_vm6, %v3759_v16 }
0x10e0   :  { %2677 = vrot.lane.b32.xlu1 %v3305_v61, %s3758_s30  ;;  %2682 = vrot.lane.b32.xlu0 %v3759_v16, %s3772_s20 }
0x10e4   :  { %2769 = vrot.lane.b32.xlu1 %v3305_v61, %s3775_s22  ;;  %2760 = vperm.xlu0 %3749, %v3305_v61  }
0x10e8   :  { %2766 = vperm.xlu1 %3747, %v3305_v61   ;;  %2852 = vrot.lane.b32.xlu0 %v3310_v50, %s3772_s20 }
0x10ec   :  { %2928 = vrot.lane.b32.xlu1 %v3759_v16, %s3777_s25 }
0x10ed   :  { %3751 = vset.pattern.permute.xlu1 %v3762_v23 }
0x114e   :  { %v2681_v32 = vpop.permute.xlu1 %2680  ;;  %v2602_v33 = vpop.permute.xlu0 %2601 }
0x114f   :  { %v2603_v34 = vsel %vm1020_vm7, %v2600_v31, %v2602_v33 }
0x1150   :  { %3579 = vmatpush3.msra.mxu0 %v2603_v34 }
0x1151   :  { %3581 = vmatmul.mubr.msk.f32.vlgmr.msra.gmra.mrb[24].mxu0 %vm1020_vm7, %v3305_v61  ;;  %3588 = vmatprep.subr.mxu0 %v3759_v16 }
0x1152   :  { %v2683_v35 = vpop.permute.xlu0 %2682  ;;  %v2678_v36 = vpop.permute.xlu1 %2677  ;;  %3590 = vmatprep.mubr.msk.f32.mxu0 %vm3770_vm6, %v3759_v16 }
0x1153   :  { %v2684_v37 = vsel %vm1180_vm8, %v2681_v32, %v2683_v35 }
0x1154   :  { %3584 = vmatpush3.msra.mxu1 %v2684_v37 }
0x1155   :  { %3586 = vmatmul.mubr.msk.f32.vlgmr.msra.gmra.mrb[26].mxu1 %vm1020_vm7, %v2678_v36  ;;  %3593 = vmatprep.subr.mxu1 %v3759_v16 }
0x1156   :  { %3595 = vmatprep.mubr.msk.f32.mxu1 %vm3770_vm6, %v3759_v16  ;;  %v2770_v49 = vpop.permute.xlu1 %2769 }
0x1163   :  { %v2761_v44 = vpop.permute.xlu0 %2760 }
0x1167   :  { %v2767_v51 = vpop.permute.xlu1 %2766  ;;  %v2853_v57 = vpop.permute.xlu0 %2852 }
0x116b   :  { %v2929_v58 = vpop.permute.xlu1 %2928 }
0x11b1   :  { %v2593_v38 = vpop.f32.mrb[24].mxu1 }
0x11b2   :  { %v3577_v39 = vpop.f32.mrb[25].mxu1 }
0x1224   :  { %v2673_v40 = vpop.f32.mrb[24].mxu0 }
0x1225   :  { %v2674_v41 = vadd.f32 %v2673_v40, %v2593_v38  ;;  %v3582_v42 = vpop.f32.mrb[25].mxu0 }
0x1228   :  { %v2754_v43 = vpop.f32.mrb[26].mxu1 }
0x1229   :  { %v2758_v45 = vadd.f32 %v2754_v43, %v2674_v41  ;;  %v3587_v46 = vpop.f32.mrb[27].mxu1 }
0x122b   :  { %v2763_v47 = vadd.f32 %v2761_v44, %v2758_v45 }
0x122d   :  { %v2764_v48 = vmax.f32 %v2763_v47, 0.0 }
0x122f   :  { %3589 = vmatpush3.msra.mxu0 %v2764_v48 }
0x1230   :  { %3591 = vmatmul.mubr.msk.f32.vlgmr.msra.gmra.mrb[26].mxu0 %vm1020_vm7, %v2770_v49  ;;  %3598 = vmatprep.subr.mxu0 %v3759_v16 }
0x1231   :  { %3600 = vmatprep.mubr.msk.f32.mxu0 %vm3770_vm6, %v3759_v16 }
0x1303   :  { %v2839_v52 = vpop.f32.mrb[26].mxu0 }
0x1304   :  { %v2840_v53 = vadd.f32 %v2839_v52, %v2767_v51  ;;  %v3592_v54 = vpop.f32.mrb[27].mxu0 }
0x1306   :  { %v2843_v55 = vadd.f32 %v2840_v53, %v2515_v29 }
0x1308   :  { %v2844_v56 = vmul.f32 %v3911_v0, %v2843_v55 }
0x130a   :  { %3009 = vrot.lane.b32.xlu1 %v2844_v56, %s3758_s30  ;;  %2930 = vrot.lane.b32.xlu0 %v2844_v56, %s3777_s25 }
0x130b   :  { %3594 = vmatpush3.msra.mxu1 %v2844_v56 }
0x130c   :  { %3596 = vmatmul.mubr.msk.f32.vlgmr.msra.gmra.mrb[28].mxu1 %vm1020_vm7, %v2853_v57  ;;  %3603 = vmatprep.subr.mxu1 %v3759_v16 }
0x130d   :  { %3605 = vmatprep.mubr.msk.f32.mxu1 %vm3770_vm6, %v3759_v16 }
0x130e   :  { %3011 = vrot.lane.b32.xlu0 %v3759_v16, %s3758_s30  ;;  %3006 = vrot.lane.b32.xlu1 %v3310_v50, %s3758_s30 }
0x1312   :  { %3089 = vperm.xlu0 %3749, %v3310_v50   ;;  %3098 = vrot.lane.b32.xlu1 %v3310_v50, %s3775_s22 }
0x1316   :  { %3750 = vset.pattern.permute.xlu0 %v3776_v13 }
0x1317   :  { %3095 = vperm.xlu0 %3750, %v3310_v50  }
0x131b   :  { %3752 = vset.pattern.permute.xlu0 %v3762_v23  ;;  %v3174_v23 = vld [vmem:[%s4201_s4] sm:$0xf] }
0x131c   :  { %3180 = vrot.lane.b32.xlu1 %v3174_v23, %s3782_s15 }
0x1320   :  { %3177 = vperm.xlu1 %3751, %v3174_v23  }
0x137c   :  { %v3010_v59 = vpop.permute.xlu1 %3009  ;;  %v2931_v60 = vpop.permute.xlu0 %2930 }
0x137d   :  { %v2932_v62 = vsel %vm144_vm1, %v2929_v58, %v2931_v60 }
0x137e   :  { %3599 = vmatpush3.msra.mxu0 %v2932_v62 }
0x137f   :  { %3601 = vmatmul.mubr.msk.f32.vlgmr.msra.gmra.mrb[28].mxu0 %vm1020_vm7, %v3310_v50  ;;  %3608 = vmatprep.subr.mxu0 %v3759_v16 }
0x1380   :  { %v3012_v63 = vpop.permute.xlu0 %3011  ;;  %v3007_v1 = vpop.permute.xlu1 %3006  ;;  %3610 = vmatprep.mubr.msk.f32.mxu0 %vm3770_vm6, %v3759_v16 }
0x1381   :  { %v3013_v13 = vsel %vm1510_vm9, %v3010_v59, %v3012_v63 }
0x1382   :  { %3604 = vmatpush3.msra.mxu1 %v3013_v13 }
0x1383   :  { %3606 = vmatmul.mubr.msk.f32.vlgmr.msra.gmra.mrb[30].mxu1 %vm1020_vm7, %v3007_v1  ;;  %3613 = vmatprep.subr.mxu1 %v3759_v16 }
0x1384   :  { %3615 = vmatprep.mubr.msk.f32.mxu1 %vm3770_vm6, %v3759_v16  ;;  %v3099_v12 = vpop.permute.xlu1 %3098 }
0x138e   :  { %v3181_v20 = vpop.permute.xlu1 %3180 }
0x1391   :  { %v3090_v10 = vpop.permute.xlu0 %3089 }
0x1396   :  { %v3096_v16 = vpop.permute.xlu0 %3095 }
0x139f   :  { %v3178_v21 = vpop.permute.xlu1 %3177 }
0x13df   :  { %v2922_v2 = vpop.f32.mrb[28].mxu1 }
0x13e0   :  { %v3597_v3 = vpop.f32.mrb[29].mxu1 }
0x1452   :  { %v3002_v5 = vpop.f32.mrb[28].mxu0 }
0x1453   :  { %v3003_v6 = vadd.f32 %v3002_v5, %v2922_v2  ;;  %v3602_v7 = vpop.f32.mrb[29].mxu0 }
0x1456   :  { %v3083_v8 = vpop.f32.mrb[30].mxu1 }
0x1457   :  { %v3087_v9 = vadd.f32 %v3083_v8, %v3003_v6  ;;  %v3607_v61 = vpop.f32.mrb[31].mxu1 }
0x1459   :  { %v3092_v4 = vadd.f32 %v3090_v10, %v3087_v9 }
0x145b   :  { %v3093_v11 = vmax.f32 %v3092_v4, 0.0 }
0x145d   :  { %3609 = vmatpush3.msra.mxu0 %v3093_v11 }
0x145e   :  { %3611 = vmatmul.mubr.msk.f32.vlgmr.msra.gmra.mrb[30].mxu0 %vm1020_vm7, %v3099_v12 }
0x1531   :  { %v3168_v14 = vpop.f32.mrb[30].mxu0 }
0x1532   :  { %v3169_v15 = vadd.f32 %v3168_v14, %v3096_v16  ;;  %v3612_v17 = vpop.f32.mrb[31].mxu0 }
0x1534   :  { %v3172_v18 = vadd.f32 %v3169_v15, %v2844_v56 }
0x1536   :  { %v3173_v19 = vmul.f32 %v3911_v0, %v3172_v18 }
0x1538   :  { %3614 = vmatpush3.msra.mxu1 %v3173_v19 }
0x1539   :  { %3616 = vmatmul.mubr.msk.f32.vlgmr.msra.gmra.mrb[32].mxu1 %vm1020_vm7, %v3181_v20 }
0x160c   :  { %v3250_v22 = vpop.f32.mrb[32].mxu1 }
0x160d   :  { %v3251_v24 = vadd.f32 %v3250_v22, %v3178_v21  ;;  %v3617_v25 = vpop.f32.mrb[33].mxu1 }
0x160f   :  { %v3254_v26 = vmul.f32 %v3911_v0, %v3251_v24 }
0x1611   :  { %3316 = vst [vmem:[%s4205_s5 + $0x4] sm:$0xf] %v3254_v26 }

</bundles_post_ra>
